<compile_context>
chip_gen: v7x
topology: tpu7x:2x2x1
jax: 0.10.0
libtpu: 0.0.40
codegen_flags: <defaults>
</compile_context>

<pallas_src>
import functools

import jax
import jax.numpy as jnp
from jax.experimental import pallas as pl
from jax.experimental.pallas import tpu as pltpu

# ---- small synthetic "bert-base-cased"-like config ----
VOCAB = 100
TYPE_VOCAB = 2
MAX_POS = 64
HIDDEN = 32
NUM_LAYERS = 2
NUM_HEADS = 4
HEAD_DIM = HIDDEN // NUM_HEADS
INTERMEDIATE = 64
LN_EPS = 1e-12


# ----------------------------- Pallas kernels -------------------------------

def _ln(x, g, b):
    mu = jnp.mean(x, axis=-1, keepdims=True)
    var = jnp.mean(jnp.square(x - mu), axis=-1, keepdims=True)
    return (x - mu) * jax.lax.rsqrt(var + LN_EPS) * g + b


def _embed_ln_kernel(x_ref, g_ref, b_ref, o_ref):
    o_ref[...] = _ln(x_ref[...], g_ref[...], b_ref[...])


def _bert_layer_kernel(x_ref, bias_ref,
                       wq_ref, bq_ref, wk_ref, bk_ref, wv_ref, bv_ref,
                       wo_ref, bo_ref, ln1g_ref, ln1b_ref,
                       w1_ref, b1_ref, w2_ref, b2_ref,
                       ln2g_ref, ln2b_ref,
                       o_ref, ctx_scr, *, B, S, nH, dH, scale):
    # Fully fused post-LN transformer block (HF BertLayer structure).
    x = x_ref[...]                                                   # (B*S, H)
    q = jnp.dot(x, wq_ref[...], preferred_element_type=jnp.float32) + bq_ref[...]
    k = jnp.dot(x, wk_ref[...], preferred_element_type=jnp.float32) + bk_ref[...]
    v = jnp.dot(x, wv_ref[...], preferred_element_type=jnp.float32) + bv_ref[...]
    bias = bias_ref[...]                                             # (B, S)

    # Self-attention: static unroll over (batch, head); heads are static lane
    # slices of the VMEM-resident 32-lane Q/K/V tiles (no transposes).
    for b in range(B):
        rows = slice(b * S, (b + 1) * S)
        bias_b = bias[b:b + 1, :]                    # (1, S) additive key mask
        for h in range(nH):
            lanes = slice(h * dH, (h + 1) * dH)
            qh = q[rows, lanes]                                      # (S, dH)
            kh = k[rows, lanes]
            vh = v[rows, lanes]
            s = jnp.dot(qh, kh.T, preferred_element_type=jnp.float32) * scale
            s = s + bias_b
            s = s - jnp.max(s, axis=-1, keepdims=True)
            p = jnp.exp(s)
            p = p / jnp.sum(p, axis=-1, keepdims=True)
            ctx_scr[rows, lanes] = jnp.dot(p, vh,
                                           preferred_element_type=jnp.float32)

    attn_out = (jnp.dot(ctx_scr[...], wo_ref[...],
                        preferred_element_type=jnp.float32) + bo_ref[...])
    # residual + LN fused
    y = _ln(x + attn_out, ln1g_ref[...], ln1b_ref[...])

    # TODO(synk): HF BERT uses exact erf-GELU; tanh-approx GELU is used here
    # (lowers cleanly to the EUP on TPU).
    ff = jax.nn.gelu(jnp.dot(y, w1_ref[...],
                             preferred_element_type=jnp.float32) + b1_ref[...],
                     approximate=True)
    ff = jnp.dot(ff, w2_ref[...], preferred_element_type=jnp.float32) + b2_ref[...]
    o_ref[...] = _ln(y + ff, ln2g_ref[...], ln2b_ref[...])


def _lstm_regressor_kernel(x_ref, wih_ref, whh_ref, b_ref, rw_ref, rb_ref,
                           o_ref, *, B, S, H):
    # x_ref: (S*B, H) time-major rows (row t*B + b). PyTorch gate order i,f,g,o.
    # Input projection hoisted out of the recurrence: one lane-dense matmul.
    gx = (jnp.dot(x_ref[...], wih_ref[...],
                  preferred_element_type=jnp.float32) + b_ref[...])   # (S*B, 4H)
    whh = whh_ref[...]
    h = jnp.zeros((B, H), jnp.float32)
    c = jnp.zeros((B, H), jnp.float32)
    for t in range(S):                                   # static unroll (S=8)
        gates = gx[t * B:(t + 1) * B, :] + jnp.dot(
            h, whh, preferred_element_type=jnp.float32)              # (B, 4H)
        i = jax.nn.sigmoid(gates[:, 0 * H:1 * H])
        f = jax.nn.sigmoid(gates[:, 1 * H:2 * H])
        g = jnp.tanh(gates[:, 2 * H:3 * H])
        o = jax.nn.sigmoid(gates[:, 3 * H:4 * H])
        c = f * c + i * g
        h = o * jnp.tanh(c)
    # Fused regressor epilogue: Linear(H, 1) on h_T == out[:, -1, :].
    o_ref[...] = (jnp.dot(h, rw_ref[...],
                          preferred_element_type=jnp.float32) + rb_ref[...])


# ------------------------------ kernel wrappers ------------------------------

def pallas_embed_ln(x, g, b):
    M, H = x.shape
    return pl.pallas_call(
        _embed_ln_kernel,
        out_shape=jax.ShapeDtypeStruct((M, H), jnp.float32),
    )(x, g.reshape(1, H), b.reshape(1, H))


def pallas_bert_layer(x, bias, lp, B, S):
    H = HIDDEN
    kern = functools.partial(_bert_layer_kernel, B=B, S=S, nH=NUM_HEADS,
                             dH=HEAD_DIM, scale=1.0 / (HEAD_DIM ** 0.5))
    return pl.pallas_call(
        kern,
        out_shape=jax.ShapeDtypeStruct((B * S, H), jnp.float32),
        scratch_shapes=[pltpu.VMEM((B * S, H), jnp.float32)],   # attention ctx
    )(x, bias,
      lp["wq"], lp["bq"].reshape(1, H),
      lp["wk"], lp["bk"].reshape(1, H),
      lp["wv"], lp["bv"].reshape(1, H),
      lp["wo"], lp["bo"].reshape(1, H),
      lp["ln1_g"].reshape(1, H), lp["ln1_b"].reshape(1, H),
      lp["w1"], lp["b1"].reshape(1, INTERMEDIATE),
      lp["w2"], lp["b2"].reshape(1, H),
      lp["ln2_g"].reshape(1, H), lp["ln2_b"].reshape(1, H))


def pallas_lstm_regressor(x_tm, w_ih, w_hh, b, reg_w, reg_b, B, S):
    H = HIDDEN
    kern = functools.partial(_lstm_regressor_kernel, B=B, S=S, H=H)
    return pl.pallas_call(
        kern,
        out_shape=jax.ShapeDtypeStruct((B, 1), jnp.float32),
    )(x_tm, w_ih, w_hh, b.reshape(1, 4 * H), reg_w, reg_b.reshape(1, 1))


# ------------------------------ model (glue) ---------------------------------

def init_params(key):
    keys = iter(jax.random.split(key, 256))

    def dense(fan_in, fan_out):
        w = 0.02 * jax.random.normal(next(keys), (fan_in, fan_out), jnp.float32)
        return w, jnp.zeros((fan_out,), jnp.float32)

    p = {}
    p["word_emb"] = 0.02 * jax.random.normal(next(keys), (VOCAB, HIDDEN), jnp.float32)
    p["pos_emb"] = 0.02 * jax.random.normal(next(keys), (MAX_POS, HIDDEN), jnp.float32)
    p["type_emb"] = 0.02 * jax.random.normal(next(keys), (TYPE_VOCAB, HIDDEN), jnp.float32)
    p["emb_ln_g"] = jnp.ones((HIDDEN,), jnp.float32)
    p["emb_ln_b"] = jnp.zeros((HIDDEN,), jnp.float32)

    p["layers"] = []
    for _ in range(NUM_LAYERS):
        lp = {}
        lp["wq"], lp["bq"] = dense(HIDDEN, HIDDEN)
        lp["wk"], lp["bk"] = dense(HIDDEN, HIDDEN)
        lp["wv"], lp["bv"] = dense(HIDDEN, HIDDEN)
        lp["wo"], lp["bo"] = dense(HIDDEN, HIDDEN)
        lp["ln1_g"] = jnp.ones((HIDDEN,), jnp.float32)
        lp["ln1_b"] = jnp.zeros((HIDDEN,), jnp.float32)
        lp["w1"], lp["b1"] = dense(HIDDEN, INTERMEDIATE)
        lp["w2"], lp["b2"] = dense(INTERMEDIATE, HIDDEN)
        lp["ln2_g"] = jnp.ones((HIDDEN,), jnp.float32)
        lp["ln2_b"] = jnp.zeros((HIDDEN,), jnp.float32)
        p["layers"].append(lp)

    s = 1.0 / (HIDDEN ** 0.5)
    p["lstm_wih"] = s * jax.random.normal(next(keys), (HIDDEN, 4 * HIDDEN), jnp.float32)
    p["lstm_whh"] = s * jax.random.normal(next(keys), (HIDDEN, 4 * HIDDEN), jnp.float32)
    p["lstm_b"] = jnp.zeros((4 * HIDDEN,), jnp.float32)   # b_ih + b_hh combined

    p["reg_w"], p["reg_b"] = dense(HIDDEN, 1)
    return p


@jax.jit
def classification_forward(params, input_ids, attention_mask, token_type_ids):
    B, S = input_ids.shape
    H = HIDDEN

    # BERT embeddings (lookups are glue; LayerNorm runs in Pallas). Dropout is
    # identity in eval mode and therefore omitted.
    pos_ids = jnp.arange(S)
    x = (jnp.take(params["word_emb"], input_ids, axis=0)
         + jnp.take(params["pos_emb"], pos_ids, axis=0)[None, :, :]
         + jnp.take(params["type_emb"], token_type_ids, axis=0))
    x = pallas_embed_ln(x.reshape(B * S, H), params["emb_ln_g"], params["emb_ln_b"])

    # HF-style additive attention mask over keys: (1 - mask) * large_negative.
    bias = (1.0 - attention_mask.astype(jnp.float32)) * -1e9           # (B, S)

    for lp in params["layers"]:
        x = pallas_bert_layer(x, bias, lp, B, S)                    # (B*S, H)

    # nn.LSTM(batch_first=True) with zero initial state; out[:, -1, :] == h_T.
    # Present the sequence time-major (row t*B + b) so the hoisted input
    # projection inside the kernel is a single lane-dense matmul.
    # TODO(synk): like a naive out[:, -1, :], padded timesteps feed the LSTM
    # (no pack_padded_sequence semantics) -- matches the PyTorch reference.
    x_tm = x.reshape(B, S, H).transpose(1, 0, 2).reshape(S * B, H)
    logits = pallas_lstm_regressor(x_tm, params["lstm_wih"], params["lstm_whh"],
                                   params["lstm_b"], params["reg_w"],
                                   params["reg_b"], B, S)
    return logits  # (B, 1)


# ----------------------------------- main ------------------------------------

if __name__ == "__main__":
    key = jax.random.PRNGKey(0)
    pkey, ikey = jax.random.split(key)
    params = init_params(pkey)

    B, S = 2, 8
    input_ids = jax.random.randint(ikey, (B, S), 0, VOCAB, dtype=jnp.int32)
    attention_mask = jnp.ones((B, S), jnp.int32).at[1, 6:].set(0)   # pad last 2 of batch 1
    token_type_ids = jnp.zeros((B, S), jnp.int32).at[:, S // 2:].set(1)

    logits = classification_forward(params, input_ids, attention_mask, token_type_ids)
    logits = jax.block_until_ready(logits)
    assert logits.shape == (B, 1) and logits.dtype == jnp.float32
    assert bool(jnp.all(jnp.isfinite(logits)))
    print("KERNEL_OK")
</pallas_src>

<mosaic_0001>
module attributes {stable_mosaic.version = 11 : i64} {
  func.func @_embed_ln_kernel(%arg0: memref<16x32xf32, #tpu.memory_space<vmem>>, %arg1: memref<1x32xf32, #tpu.memory_space<vmem>>, %arg2: memref<1x32xf32, #tpu.memory_space<vmem>>, %arg3: memref<16x32xf32, #tpu.memory_space<vmem>>) attributes {dimension_semantics = [], scalar_prefetch = 0 : i64, scratch_operands = 0 : i64, tpu.core_type = #tpu.core_type<tc>} {
    %c0 = arith.constant 0 : index
    %c0_0 = arith.constant 0 : index
    %0 = vector.load %arg0[%c0, %c0_0] : memref<16x32xf32, #tpu.memory_space<vmem>>, vector<16x32xf32>
    %c0_1 = arith.constant 0 : index
    %c0_2 = arith.constant 0 : index
    %1 = vector.load %arg1[%c0_1, %c0_2] : memref<1x32xf32, #tpu.memory_space<vmem>>, vector<1x32xf32>
    %c0_3 = arith.constant 0 : index
    %c0_4 = arith.constant 0 : index
    %2 = vector.load %arg2[%c0_3, %c0_4] : memref<1x32xf32, #tpu.memory_space<vmem>>, vector<1x32xf32>
    %cst = arith.constant dense<0.000000e+00> : vector<16xf32>
    %3 = vector.multi_reduction <add>, %0, %cst [1] : vector<16x32xf32> to vector<16xf32>
    %4 = vector.shape_cast %3 : vector<16xf32> to vector<16x1xf32>
    %cst_5 = arith.constant 3.200000e+01 : f32
    %5 = vector.broadcast %cst_5 : f32 to vector<16x1xf32>
    %6 = arith.divf %4, %5 : vector<16x1xf32>
    %7 = vector.broadcast %6 : vector<16x1xf32> to vector<16x32xf32>
    %8 = arith.subf %0, %7 : vector<16x32xf32>
    %9 = arith.mulf %8, %8 : vector<16x32xf32>
    %cst_6 = arith.constant dense<0.000000e+00> : vector<16xf32>
    %10 = vector.multi_reduction <add>, %9, %cst_6 [1] : vector<16x32xf32> to vector<16xf32>
    %11 = vector.shape_cast %10 : vector<16xf32> to vector<16x1xf32>
    %cst_7 = arith.constant 3.200000e+01 : f32
    %12 = vector.broadcast %cst_7 : f32 to vector<16x1xf32>
    %13 = arith.divf %11, %12 : vector<16x1xf32>
    %14 = vector.broadcast %6 : vector<16x1xf32> to vector<16x32xf32>
    %15 = arith.subf %0, %14 : vector<16x32xf32>
    %cst_8 = arith.constant 9.99999996E-13 : f32
    %16 = vector.broadcast %cst_8 : f32 to vector<16x1xf32>
    %17 = arith.addf %13, %16 : vector<16x1xf32>
    %18 = math.rsqrt %17 : vector<16x1xf32>
    %19 = vector.broadcast %18 : vector<16x1xf32> to vector<16x32xf32>
    %20 = arith.mulf %15, %19 : vector<16x32xf32>
    %21 = vector.broadcast %1 : vector<1x32xf32> to vector<16x32xf32>
    %22 = arith.mulf %20, %21 : vector<16x32xf32>
    %23 = vector.broadcast %2 : vector<1x32xf32> to vector<16x32xf32>
    %24 = arith.addf %22, %23 : vector<16x32xf32>
    %c0_9 = arith.constant 0 : index
    %c0_10 = arith.constant 0 : index
    %25 = vector.load %arg3[%c0_9, %c0_10] : memref<16x32xf32, #tpu.memory_space<vmem>>, vector<16x32xf32>
    tpu.vector_store %arg3[%c0_9, %c0_10], %24 {strides = array<i32>} : memref<16x32xf32, #tpu.memory_space<vmem>>, vector<16x32xf32>,
    return
  }
}

module attributes {stable_mosaic.version = 11 : i64} {
  func.func @_bert_layer_kernel(%arg0: memref<16x32xf32, #tpu.memory_space<vmem>>, %arg1: memref<2x8xf32, #tpu.memory_space<vmem>>, %arg2: memref<32x32xf32, #tpu.memory_space<vmem>>, %arg3: memref<1x32xf32, #tpu.memory_space<vmem>>, %arg4: memref<32x32xf32, #tpu.memory_space<vmem>>, %arg5: memref<1x32xf32, #tpu.memory_space<vmem>>, %arg6: memref<32x32xf32, #tpu.memory_space<vmem>>, %arg7: memref<1x32xf32, #tpu.memory_space<vmem>>, %arg8: memref<32x32xf32, #tpu.memory_space<vmem>>, %arg9: memref<1x32xf32, #tpu.memory_space<vmem>>, %arg10: memref<1x32xf32, #tpu.memory_space<vmem>>, %arg11: memref<1x32xf32, #tpu.memory_space<vmem>>, %arg12: memref<32x64xf32, #tpu.memory_space<vmem>>, %arg13: memref<1x64xf32, #tpu.memory_space<vmem>>, %arg14: memref<64x32xf32, #tpu.memory_space<vmem>>, %arg15: memref<1x32xf32, #tpu.memory_space<vmem>>, %arg16: memref<1x32xf32, #tpu.memory_space<vmem>>, %arg17: memref<1x32xf32, #tpu.memory_space<vmem>>, %arg18: memref<16x32xf32, #tpu.memory_space<vmem>>, %arg19: memref<16x32xf32, #tpu.memory_space<vmem>>) attributes {dimension_semantics = [], scalar_prefetch = 0 : i64, scratch_operands = 1 : i64, tpu.core_type = #tpu.core_type<tc>} {
    %c0 = arith.constant 0 : index
    %c0_0 = arith.constant 0 : index
    %0 = vector.load %arg0[%c0, %c0_0] : memref<16x32xf32, #tpu.memory_space<vmem>>, vector<16x32xf32>
    %c0_1 = arith.constant 0 : index
    %c0_2 = arith.constant 0 : index
    %1 = vector.load %arg2[%c0_1, %c0_2] : memref<32x32xf32, #tpu.memory_space<vmem>>, vector<32x32xf32>
    %cst = arith.constant dense<0.000000e+00> : vector<16x32xf32>
    %2 = tpu.matmul %0, %1, %cst {dimension_numbers = #tpu.dot_dimension_numbers<[1], [0], [0], [1], [0, 0, 1, 1], [], []>} : vector<16x32xf32>, vector<32x32xf32>, vector<16x32xf32> -> vector<16x32xf32>
    %c0_3 = arith.constant 0 : index
    %c0_4 = arith.constant 0 : index
    %3 = vector.load %arg3[%c0_3, %c0_4] : memref<1x32xf32, #tpu.memory_space<vmem>>, vector<1x32xf32>
    %4 = vector.broadcast %3 : vector<1x32xf32> to vector<16x32xf32>
    %5 = arith.addf %2, %4 : vector<16x32xf32>
    %c0_5 = arith.constant 0 : index
    %c0_6 = arith.constant 0 : index
    %6 = vector.load %arg4[%c0_5, %c0_6] : memref<32x32xf32, #tpu.memory_space<vmem>>, vector<32x32xf32>
    %cst_7 = arith.constant dense<0.000000e+00> : vector<16x32xf32>
    %7 = tpu.matmul %0, %6, %cst_7 {dimension_numbers = #tpu.dot_dimension_numbers<[1], [0], [0], [1], [0, 0, 1, 1], [], []>} : vector<16x32xf32>, vector<32x32xf32>, vector<16x32xf32> -> vector<16x32xf32>
    %c0_8 = arith.constant 0 : index
    %c0_9 = arith.constant 0 : index
    %8 = vector.load %arg5[%c0_8, %c0_9] : memref<1x32xf32, #tpu.memory_space<vmem>>, vector<1x32xf32>
    %9 = vector.broadcast %8 : vector<1x32xf32> to vector<16x32xf32>
    %10 = arith.addf %7, %9 : vector<16x32xf32>
    %c0_10 = arith.constant 0 : index
    %c0_11 = arith.constant 0 : index
    %11 = vector.load %arg6[%c0_10, %c0_11] : memref<32x32xf32, #tpu.memory_space<vmem>>, vector<32x32xf32>
    %cst_12 = arith.constant dense<0.000000e+00> : vector<16x32xf32>
    %12 = tpu.matmul %0, %11, %cst_12 {dimension_numbers = #tpu.dot_dimension_numbers<[1], [0], [0], [1], [0, 0, 1, 1], [], []>} : vector<16x32xf32>, vector<32x32xf32>, vector<16x32xf32> -> vector<16x32xf32>
    %c0_13 = arith.constant 0 : index
    %c0_14 = arith.constant 0 : index
    %13 = vector.load %arg7[%c0_13, %c0_14] : memref<1x32xf32, #tpu.memory_space<vmem>>, vector<1x32xf32>
    %14 = vector.broadcast %13 : vector<1x32xf32> to vector<16x32xf32>
    %15 = arith.addf %12, %14 : vector<16x32xf32>
    %c0_15 = arith.constant 0 : index
    %c0_16 = arith.constant 0 : index
    %16 = vector.load %arg1[%c0_15, %c0_16] : memref<2x8xf32, #tpu.memory_space<vmem>>, vector<2x8xf32>
    %17 = vector.extract_strided_slice %16 {offsets = [0, 0], sizes = [1, 8], strides = [1, 1]} : vector<2x8xf32> to vector<1x8xf32>
    %18 = vector.extract_strided_slice %5 {offsets = [0, 0], sizes = [8, 8], strides = [1, 1]} : vector<16x32xf32> to vector<8x8xf32>
    %19 = vector.extract_strided_slice %10 {offsets = [0, 0], sizes = [8, 8], strides = [1, 1]} : vector<16x32xf32> to vector<8x8xf32>
    %20 = vector.extract_strided_slice %15 {offsets = [0, 0], sizes = [8, 8], strides = [1, 1]} : vector<16x32xf32> to vector<8x8xf32>
    %21 = tpu.transpose %19, [1, 0] : vector<8x8xf32> -> vector<8x8xf32>
    %cst_17 = arith.constant dense<0.000000e+00> : vector<8x8xf32>
    %22 = tpu.matmul %18, %21, %cst_17 {dimension_numbers = #tpu.dot_dimension_numbers<[1], [0], [0], [1], [0, 0, 1, 1], [], []>} : vector<8x8xf32>, vector<8x8xf32>, vector<8x8xf32> -> vector<8x8xf32>
    %cst_18 = arith.constant 0.353553385 : f32
    %23 = vector.broadcast %cst_18 : f32 to vector<8x8xf32>
    %24 = arith.mulf %22, %23 : vector<8x8xf32>
    %25 = vector.broadcast %17 : vector<1x8xf32> to vector<8x8xf32>
    %26 = arith.addf %24, %25 : vector<8x8xf32>
    %cst_19 = arith.constant dense<0xFF800000> : vector<8xf32>
    %27 = vector.multi_reduction <maximumf>, %26, %cst_19 [1] : vector<8x8xf32> to vector<8xf32>
    %28 = vector.shape_cast %27 : vector<8xf32> to vector<8x1xf32>
    %29 = vector.broadcast %28 : vector<8x1xf32> to vector<8x8xf32>
    %30 = arith.subf %26, %29 : vector<8x8xf32>
    %31 = math.exp %30 : vector<8x8xf32>
    %cst_20 = arith.constant dense<0.000000e+00> : vector<8xf32>
    %32 = vector.multi_reduction <add>, %31, %cst_20 [1] : vector<8x8xf32> to vector<8xf32>
    %33 = vector.shape_cast %32 : vector<8xf32> to vector<8x1xf32>
    %34 = vector.broadcast %33 : vector<8x1xf32> to vector<8x8xf32>
    %35 = arith.divf %31, %34 : vector<8x8xf32>
    %cst_21 = arith.constant dense<0.000000e+00> : vector<8x8xf32>
    %36 = tpu.matmul %35, %20, %cst_21 {dimension_numbers = #tpu.dot_dimension_numbers<[1], [0], [0], [1], [0, 0, 1, 1], [], []>} : vector<8x8xf32>, vector<8x8xf32>, vector<8x8xf32> -> vector<8x8xf32>
    %c0_22 = arith.constant 0 : index
    %c0_23 = arith.constant 0 : index
    %37 = vector.load %arg19[%c0_22, %c0_23] : memref<16x32xf32, #tpu.memory_space<vmem>>, vector<8x8xf32>
    tpu.vector_store %arg19[%c0_22, %c0_23], %36 {strides = array<i32>} : memref<16x32xf32, #tpu.memory_space<vmem>>, vector<8x8xf32>,
    %38 = vector.extract_strided_slice %5 {offsets = [0, 8], sizes = [8, 8], strides = [1, 1]} : vector<16x32xf32> to vector<8x8xf32>
    %39 = vector.extract_strided_slice %10 {offsets = [0, 8], sizes = [8, 8], strides = [1, 1]} : vector<16x32xf32> to vector<8x8xf32>
    %40 = vector.extract_strided_slice %15 {offsets = [0, 8], sizes = [8, 8], strides = [1, 1]} : vector<16x32xf32> to vector<8x8xf32>
    %41 = tpu.transpose %39, [1, 0] : vector<8x8xf32> -> vector<8x8xf32>
    %cst_24 = arith.constant dense<0.000000e+00> : vector<8x8xf32>
    %42 = tpu.matmul %38, %41, %cst_24 {dimension_numbers = #tpu.dot_dimension_numbers<[1], [0], [0], [1], [0, 0, 1, 1], [], []>} : vector<8x8xf32>, vector<8x8xf32>, vector<8x8xf32> -> vector<8x8xf32>
    %cst_25 = arith.constant 0.353553385 : f32
    %43 = vector.broadcast %cst_25 : f32 to vector<8x8xf32>
    %44 = arith.mulf %42, %43 : vector<8x8xf32>
    %45 = vector.broadcast %17 : vector<1x8xf32> to vector<8x8xf32>
    %46 = arith.addf %44, %45 : vector<8x8xf32>
    %cst_26 = arith.constant dense<0xFF800000> : vector<8xf32>
    %47 = vector.multi_reduction <maximumf>, %46, %cst_26 [1] : vector<8x8xf32> to vector<8xf32>
    %48 = vector.shape_cast %47 : vector<8xf32> to vector<8x1xf32>
    %49 = vector.broadcast %48 : vector<8x1xf32> to vector<8x8xf32>
    %50 = arith.subf %46, %49 : vector<8x8xf32>
    %51 = math.exp %50 : vector<8x8xf32>
    %cst_27 = arith.constant dense<0.000000e+00> : vector<8xf32>
    %52 = vector.multi_reduction <add>, %51, %cst_27 [1] : vector<8x8xf32> to vector<8xf32>
    %53 = vector.shape_cast %52 : vector<8xf32> to vector<8x1xf32>
    %54 = vector.broadcast %53 : vector<8x1xf32> to vector<8x8xf32>
    %55 = arith.divf %51, %54 : vector<8x8xf32>
    %cst_28 = arith.constant dense<0.000000e+00> : vector<8x8xf32>
    %56 = tpu.matmul %55, %40, %cst_28 {dimension_numbers = #tpu.dot_dimension_numbers<[1], [0], [0], [1], [0, 0, 1, 1], [], []>} : vector<8x8xf32>, vector<8x8xf32>, vector<8x8xf32> -> vector<8x8xf32>
    %c0_29 = arith.constant 0 : index
    %c8 = arith.constant 8 : index
    %57 = vector.load %arg19[%c0_29, %c8] : memref<16x32xf32, #tpu.memory_space<vmem>>, vector<8x8xf32>
    tpu.vector_store %arg19[%c0_29, %c8], %56 {strides = array<i32>} : memref<16x32xf32, #tpu.memory_space<vmem>>, vector<8x8xf32>,
    %58 = vector.extract_strided_slice %5 {offsets = [0, 16], sizes = [8, 8], strides = [1, 1]} : vector<16x32xf32> to vector<8x8xf32>
    %59 = vector.extract_strided_slice %10 {offsets = [0, 16], sizes = [8, 8], strides = [1, 1]} : vector<16x32xf32> to vector<8x8xf32>
    %60 = vector.extract_strided_slice %15 {offsets = [0, 16], sizes = [8, 8], strides = [1, 1]} : vector<16x32xf32> to vector<8x8xf32>
    %61 = tpu.transpose %59, [1, 0] : vector<8x8xf32> -> vector<8x8xf32>
    %cst_30 = arith.constant dense<0.000000e+00> : vector<8x8xf32>
    %62 = tpu.matmul %58, %61, %cst_30 {dimension_numbers = #tpu.dot_dimension_numbers<[1], [0], [0], [1], [0, 0, 1, 1], [], []>} : vector<8x8xf32>, vector<8x8xf32>, vector<8x8xf32> -> vector<8x8xf32>
    %cst_31 = arith.constant 0.353553385 : f32
    %63 = vector.broadcast %cst_31 : f32 to vector<8x8xf32>
    %64 = arith.mulf %62, %63 : vector<8x8xf32>
    %65 = vector.broadcast %17 : vector<1x8xf32> to vector<8x8xf32>
    %66 = arith.addf %64, %65 : vector<8x8xf32>
    %cst_32 = arith.constant dense<0xFF800000> : vector<8xf32>
    %67 = vector.multi_reduction <maximumf>, %66, %cst_32 [1] : vector<8x8xf32> to vector<8xf32>
    %68 = vector.shape_cast %67 : vector<8xf32> to vector<8x1xf32>
    %69 = vector.broadcast %68 : vector<8x1xf32> to vector<8x8xf32>
    %70 = arith.subf %66, %69 : vector<8x8xf32>
    %71 = math.exp %70 : vector<8x8xf32>
    %cst_33 = arith.constant dense<0.000000e+00> : vector<8xf32>
    %72 = vector.multi_reduction <add>, %71, %cst_33 [1] : vector<8x8xf32> to vector<8xf32>
    %73 = vector.shape_cast %72 : vector<8xf32> to vector<8x1xf32>
    %74 = vector.broadcast %73 : vector<8x1xf32> to vector<8x8xf32>
    %75 = arith.divf %71, %74 : vector<8x8xf32>
    %cst_34 = arith.constant dense<0.000000e+00> : vector<8x8xf32>
    %76 = tpu.matmul %75, %60, %cst_34 {dimension_numbers = #tpu.dot_dimension_numbers<[1], [0], [0], [1], [0, 0, 1, 1], [], []>} : vector<8x8xf32>, vector<8x8xf32>, vector<8x8xf32> -> vector<8x8xf32>
    %c0_35 = arith.constant 0 : index
    %c16 = arith.constant 16 : index
    %77 = vector.load %arg19[%c0_35, %c16] : memref<16x32xf32, #tpu.memory_space<vmem>>, vector<8x8xf32>
    tpu.vector_store %arg19[%c0_35, %c16], %76 {strides = array<i32>} : memref<16x32xf32, #tpu.memory_space<vmem>>, vector<8x8xf32>,
    %78 = vector.extract_strided_slice %5 {offsets = [0, 24], sizes = [8, 8], strides = [1, 1]} : vector<16x32xf32> to vector<8x8xf32>
    %79 = vector.extract_strided_slice %10 {offsets = [0, 24], sizes = [8, 8], strides = [1, 1]} : vector<16x32xf32> to vector<8x8xf32>
    %80 = vector.extract_strided_slice %15 {offsets = [0, 24], sizes = [8, 8], strides = [1, 1]} : vector<16x32xf32> to vector<8x8xf32>
    %81 = tpu.transpose %79, [1, 0] : vector<8x8xf32> -> vector<8x8xf32>
    %cst_36 = arith.constant dense<0.000000e+00> : vector<8x8xf32>
    %82 = tpu.matmul %78, %81, %cst_36 {dimension_numbers = #tpu.dot_dimension_numbers<[1], [0], [0], [1], [0, 0, 1, 1], [], []>} : vector<8x8xf32>, vector<8x8xf32>, vector<8x8xf32> -> vector<8x8xf32>
    %cst_37 = arith.constant 0.353553385 : f32
    %83 = vector.broadcast %cst_37 : f32 to vector<8x8xf32>
    %84 = arith.mulf %82, %83 : vector<8x8xf32>
    %85 = vector.broadcast %17 : vector<1x8xf32> to vector<8x8xf32>
    %86 = arith.addf %84, %85 : vector<8x8xf32>
    %cst_38 = arith.constant dense<0xFF800000> : vector<8xf32>
    %87 = vector.multi_reduction <maximumf>, %86, %cst_38 [1] : vector<8x8xf32> to vector<8xf32>
    %88 = vector.shape_cast %87 : vector<8xf32> to vector<8x1xf32>
    %89 = vector.broadcast %88 : vector<8x1xf32> to vector<8x8xf32>
    %90 = arith.subf %86, %89 : vector<8x8xf32>
    %91 = math.exp %90 : vector<8x8xf32>
    %cst_39 = arith.constant dense<0.000000e+00> : vector<8xf32>
    %92 = vector.multi_reduction <add>, %91, %cst_39 [1] : vector<8x8xf32> to vector<8xf32>
    %93 = vector.shape_cast %92 : vector<8xf32> to vector<8x1xf32>
    %94 = vector.broadcast %93 : vector<8x1xf32> to vector<8x8xf32>
    %95 = arith.divf %91, %94 : vector<8x8xf32>
    %cst_40 = arith.constant dense<0.000000e+00> : vector<8x8xf32>
    %96 = tpu.matmul %95, %80, %cst_40 {dimension_numbers = #tpu.dot_dimension_numbers<[1], [0], [0], [1], [0, 0, 1, 1], [], []>} : vector<8x8xf32>, vector<8x8xf32>, vector<8x8xf32> -> vector<8x8xf32>
    %c0_41 = arith.constant 0 : index
    %c24 = arith.constant 24 : index
    %97 = vector.load %arg19[%c0_41, %c24] : memref<16x32xf32, #tpu.memory_space<vmem>>, vector<8x8xf32>
    tpu.vector_store %arg19[%c0_41, %c24], %96 {strides = array<i32>} : memref<16x32xf32, #tpu.memory_space<vmem>>, vector<8x8xf32>,
    %98 = vector.extract_strided_slice %16 {offsets = [1, 0], sizes = [1, 8], strides = [1, 1]} : vector<2x8xf32> to vector<1x8xf32>
    %99 = vector.extract_strided_slice %5 {offsets = [8, 0], sizes = [8, 8], strides = [1, 1]} : vector<16x32xf32> to vector<8x8xf32>
    %100 = vector.extract_strided_slice %10 {offsets = [8, 0], sizes = [8, 8], strides = [1, 1]} : vector<16x32xf32> to vector<8x8xf32>
    %101 = vector.extract_strided_slice %15 {offsets = [8, 0], sizes = [8, 8], strides = [1, 1]} : vector<16x32xf32> to vector<8x8xf32>
    %102 = tpu.transpose %100, [1, 0] : vector<8x8xf32> -> vector<8x8xf32>
    %cst_42 = arith.constant dense<0.000000e+00> : vector<8x8xf32>
    %103 = tpu.matmul %99, %102, %cst_42 {dimension_numbers = #tpu.dot_dimension_numbers<[1], [0], [0], [1], [0, 0, 1, 1], [], []>} : vector<8x8xf32>, vector<8x8xf32>, vector<8x8xf32> -> vector<8x8xf32>
    %cst_43 = arith.constant 0.353553385 : f32
    %104 = vector.broadcast %cst_43 : f32 to vector<8x8xf32>
    %105 = arith.mulf %103, %104 : vector<8x8xf32>
    %106 = vector.broadcast %98 : vector<1x8xf32> to vector<8x8xf32>
    %107 = arith.addf %105, %106 : vector<8x8xf32>
    %cst_44 = arith.constant dense<0xFF800000> : vector<8xf32>
    %108 = vector.multi_reduction <maximumf>, %107, %cst_44 [1] : vector<8x8xf32> to vector<8xf32>
    %109 = vector.shape_cast %108 : vector<8xf32> to vector<8x1xf32>
    %110 = vector.broadcast %109 : vector<8x1xf32> to vector<8x8xf32>
    %111 = arith.subf %107, %110 : vector<8x8xf32>
    %112 = math.exp %111 : vector<8x8xf32>
    %cst_45 = arith.constant dense<0.000000e+00> : vector<8xf32>
    %113 = vector.multi_reduction <add>, %112, %cst_45 [1] : vector<8x8xf32> to vector<8xf32>
    %114 = vector.shape_cast %113 : vector<8xf32> to vector<8x1xf32>
    %115 = vector.broadcast %114 : vector<8x1xf32> to vector<8x8xf32>
    %116 = arith.divf %112, %115 : vector<8x8xf32>
    %cst_46 = arith.constant dense<0.000000e+00> : vector<8x8xf32>
    %117 = tpu.matmul %116, %101, %cst_46 {dimension_numbers = #tpu.dot_dimension_numbers<[1], [0], [0], [1], [0, 0, 1, 1], [], []>} : vector<8x8xf32>, vector<8x8xf32>, vector<8x8xf32> -> vector<8x8xf32>
    %c8_47 = arith.constant 8 : index
    %c0_48 = arith.constant 0 : index
    %118 = vector.load %arg19[%c8_47, %c0_48] : memref<16x32xf32, #tpu.memory_space<vmem>>, vector<8x8xf32>
    tpu.vector_store %arg19[%c8_47, %c0_48], %117 {strides = array<i32>} : memref<16x32xf32, #tpu.memory_space<vmem>>, vector<8x8xf32>,
    %119 = vector.extract_strided_slice %5 {offsets = [8, 8], sizes = [8, 8], strides = [1, 1]} : vector<16x32xf32> to vector<8x8xf32>
    %120 = vector.extract_strided_slice %10 {offsets = [8, 8], sizes = [8, 8], strides = [1, 1]} : vector<16x32xf32> to vector<8x8xf32>
    %121 = vector.extract_strided_slice %15 {offsets = [8, 8], sizes = [8, 8], strides = [1, 1]} : vector<16x32xf32> to vector<8x8xf32>
    %122 = tpu.transpose %120, [1, 0] : vector<8x8xf32> -> vector<8x8xf32>
    %cst_49 = arith.constant dense<0.000000e+00> : vector<8x8xf32>
    %123 = tpu.matmul %119, %122, %cst_49 {dimension_numbers = #tpu.dot_dimension_numbers<[1], [0], [0], [1], [0, 0, 1, 1], [], []>} : vector<8x8xf32>, vector<8x8xf32>, vector<8x8xf32> -> vector<8x8xf32>
    %cst_50 = arith.constant 0.353553385 : f32
    %124 = vector.broadcast %cst_50 : f32 to vector<8x8xf32>
    %125 = arith.mulf %123, %124 : vector<8x8xf32>
    %126 = vector.broadcast %98 : vector<1x8xf32> to vector<8x8xf32>
    %127 = arith.addf %125, %126 : vector<8x8xf32>
    %cst_51 = arith.constant dense<0xFF800000> : vector<8xf32>
    %128 = vector.multi_reduction <maximumf>, %127, %cst_51 [1] : vector<8x8xf32> to vector<8xf32>
    %129 = vector.shape_cast %128 : vector<8xf32> to vector<8x1xf32>
    %130 = vector.broadcast %129 : vector<8x1xf32> to vector<8x8xf32>
    %131 = arith.subf %127, %130 : vector<8x8xf32>
    %132 = math.exp %131 : vector<8x8xf32>
    %cst_52 = arith.constant dense<0.000000e+00> : vector<8xf32>
    %133 = vector.multi_reduction <add>, %132, %cst_52 [1] : vector<8x8xf32> to vector<8xf32>
    %134 = vector.shape_cast %133 : vector<8xf32> to vector<8x1xf32>
    %135 = vector.broadcast %134 : vector<8x1xf32> to vector<8x8xf32>
    %136 = arith.divf %132, %135 : vector<8x8xf32>
    %cst_53 = arith.constant dense<0.000000e+00> : vector<8x8xf32>
    %137 = tpu.matmul %136, %121, %cst_53 {dimension_numbers = #tpu.dot_dimension_numbers<[1], [0], [0], [1], [0, 0, 1, 1], [], []>} : vector<8x8xf32>, vector<8x8xf32>, vector<8x8xf32> -> vector<8x8xf32>
    %c8_54 = arith.constant 8 : index
    %c8_55 = arith.constant 8 : index
    %138 = vector.load %arg19[%c8_54, %c8_55] : memref<16x32xf32, #tpu.memory_space<vmem>>, vector<8x8xf32>
    tpu.vector_store %arg19[%c8_54, %c8_55], %137 {strides = array<i32>} : memref<16x32xf32, #tpu.memory_space<vmem>>, vector<8x8xf32>,
    %139 = vector.extract_strided_slice %5 {offsets = [8, 16], sizes = [8, 8], strides = [1, 1]} : vector<16x32xf32> to vector<8x8xf32>
    %140 = vector.extract_strided_slice %10 {offsets = [8, 16], sizes = [8, 8], strides = [1, 1]} : vector<16x32xf32> to vector<8x8xf32>
    %141 = vector.extract_strided_slice %15 {offsets = [8, 16], sizes = [8, 8], strides = [1, 1]} : vector<16x32xf32> to vector<8x8xf32>
    %142 = tpu.transpose %140, [1, 0] : vector<8x8xf32> -> vector<8x8xf32>
    %cst_56 = arith.constant dense<0.000000e+00> : vector<8x8xf32>
    %143 = tpu.matmul %139, %142, %cst_56 {dimension_numbers = #tpu.dot_dimension_numbers<[1], [0], [0], [1], [0, 0, 1, 1], [], []>} : vector<8x8xf32>, vector<8x8xf32>, vector<8x8xf32> -> vector<8x8xf32>
    %cst_57 = arith.constant 0.353553385 : f32
    %144 = vector.broadcast %cst_57 : f32 to vector<8x8xf32>
    %145 = arith.mulf %143, %144 : vector<8x8xf32>
    %146 = vector.broadcast %98 : vector<1x8xf32> to vector<8x8xf32>
    %147 = arith.addf %145, %146 : vector<8x8xf32>
    %cst_58 = arith.constant dense<0xFF800000> : vector<8xf32>
    %148 = vector.multi_reduction <maximumf>, %147, %cst_58 [1] : vector<8x8xf32> to vector<8xf32>
    %149 = vector.shape_cast %148 : vector<8xf32> to vector<8x1xf32>
    %150 = vector.broadcast %149 : vector<8x1xf32> to vector<8x8xf32>
    %151 = arith.subf %147, %150 : vector<8x8xf32>
    %152 = math.exp %151 : vector<8x8xf32>
    %cst_59 = arith.constant dense<0.000000e+00> : vector<8xf32>
    %153 = vector.multi_reduction <add>, %152, %cst_59 [1] : vector<8x8xf32> to vector<8xf32>
    %154 = vector.shape_cast %153 : vector<8xf32> to vector<8x1xf32>
    %155 = vector.broadcast %154 : vector<8x1xf32> to vector<8x8xf32>
    %156 = arith.divf %152, %155 : vector<8x8xf32>
    %cst_60 = arith.constant dense<0.000000e+00> : vector<8x8xf32>
    %157 = tpu.matmul %156, %141, %cst_60 {dimension_numbers = #tpu.dot_dimension_numbers<[1], [0], [0], [1], [0, 0, 1, 1], [], []>} : vector<8x8xf32>, vector<8x8xf32>, vector<8x8xf32> -> vector<8x8xf32>
    %c8_61 = arith.constant 8 : index
    %c16_62 = arith.constant 16 : index
    %158 = vector.load %arg19[%c8_61, %c16_62] : memref<16x32xf32, #tpu.memory_space<vmem>>, vector<8x8xf32>
    tpu.vector_store %arg19[%c8_61, %c16_62], %157 {strides = array<i32>} : memref<16x32xf32, #tpu.memory_space<vmem>>, vector<8x8xf32>,
    %159 = vector.extract_strided_slice %5 {offsets = [8, 24], sizes = [8, 8], strides = [1, 1]} : vector<16x32xf32> to vector<8x8xf32>
    %160 = vector.extract_strided_slice %10 {offsets = [8, 24], sizes = [8, 8], strides = [1, 1]} : vector<16x32xf32> to vector<8x8xf32>
    %161 = vector.extract_strided_slice %15 {offsets = [8, 24], sizes = [8, 8], strides = [1, 1]} : vector<16x32xf32> to vector<8x8xf32>
    %162 = tpu.transpose %160, [1, 0] : vector<8x8xf32> -> vector<8x8xf32>
    %cst_63 = arith.constant dense<0.000000e+00> : vector<8x8xf32>
    %163 = tpu.matmul %159, %162, %cst_63 {dimension_numbers = #tpu.dot_dimension_numbers<[1], [0], [0], [1], [0, 0, 1, 1], [], []>} : vector<8x8xf32>, vector<8x8xf32>, vector<8x8xf32> -> vector<8x8xf32>
    %cst_64 = arith.constant 0.353553385 : f32
    %164 = vector.broadcast %cst_64 : f32 to vector<8x8xf32>
    %165 = arith.mulf %163, %164 : vector<8x8xf32>
    %166 = vector.broadcast %98 : vector<1x8xf32> to vector<8x8xf32>
    %167 = arith.addf %165, %166 : vector<8x8xf32>
    %cst_65 = arith.constant dense<0xFF800000> : vector<8xf32>
    %168 = vector.multi_reduction <maximumf>, %167, %cst_65 [1] : vector<8x8xf32> to vector<8xf32>
    %169 = vector.shape_cast %168 : vector<8xf32> to vector<8x1xf32>
    %170 = vector.broadcast %169 : vector<8x1xf32> to vector<8x8xf32>
    %171 = arith.subf %167, %170 : vector<8x8xf32>
    %172 = math.exp %171 : vector<8x8xf32>
    %cst_66 = arith.constant dense<0.000000e+00> : vector<8xf32>
    %173 = vector.multi_reduction <add>, %172, %cst_66 [1] : vector<8x8xf32> to vector<8xf32>
    %174 = vector.shape_cast %173 : vector<8xf32> to vector<8x1xf32>
    %175 = vector.broadcast %174 : vector<8x1xf32> to vector<8x8xf32>
    %176 = arith.divf %172, %175 : vector<8x8xf32>
    %cst_67 = arith.constant dense<0.000000e+00> : vector<8x8xf32>
    %177 = tpu.matmul %176, %161, %cst_67 {dimension_numbers = #tpu.dot_dimension_numbers<[1], [0], [0], [1], [0, 0, 1, 1], [], []>} : vector<8x8xf32>, vector<8x8xf32>, vector<8x8xf32> -> vector<8x8xf32>
    %c8_68 = arith.constant 8 : index
    %c24_69 = arith.constant 24 : index
    %178 = vector.load %arg19[%c8_68, %c24_69] : memref<16x32xf32, #tpu.memory_space<vmem>>, vector<8x8xf32>
    tpu.vector_store %arg19[%c8_68, %c24_69], %177 {strides = array<i32>} : memref<16x32xf32, #tpu.memory_space<vmem>>, vector<8x8xf32>,
    %c0_70 = arith.constant 0 : index
    %c0_71 = arith.constant 0 : index
    %179 = vector.load %arg19[%c0_70, %c0_71] : memref<16x32xf32, #tpu.memory_space<vmem>>, vector<16x32xf32>
    %c0_72 = arith.constant 0 : index
    %c0_73 = arith.constant 0 : index
    %180 = vector.load %arg8[%c0_72, %c0_73] : memref<32x32xf32, #tpu.memory_space<vmem>>, vector<32x32xf32>
    %cst_74 = arith.constant dense<0.000000e+00> : vector<16x32xf32>
    %181 = tpu.matmul %179, %180, %cst_74 {dimension_numbers = #tpu.dot_dimension_numbers<[1], [0], [0], [1], [0, 0, 1, 1], [], []>} : vector<16x32xf32>, vector<32x32xf32>, vector<16x32xf32> -> vector<16x32xf32>
    %c0_75 = arith.constant 0 : index
    %c0_76 = arith.constant 0 : index
    %182 = vector.load %arg9[%c0_75, %c0_76] : memref<1x32xf32, #tpu.memory_space<vmem>>, vector<1x32xf32>
    %183 = vector.broadcast %182 : vector<1x32xf32> to vector<16x32xf32>
    %184 = arith.addf %181, %183 : vector<16x32xf32>
    %185 = arith.addf %0, %184 : vector<16x32xf32>
    %c0_77 = arith.constant 0 : index
    %c0_78 = arith.constant 0 : index
    %186 = vector.load %arg10[%c0_77, %c0_78] : memref<1x32xf32, #tpu.memory_space<vmem>>, vector<1x32xf32>
    %c0_79 = arith.constant 0 : index
    %c0_80 = arith.constant 0 : index
    %187 = vector.load %arg11[%c0_79, %c0_80] : memref<1x32xf32, #tpu.memory_space<vmem>>, vector<1x32xf32>
    %cst_81 = arith.constant dense<0.000000e+00> : vector<16xf32>
    %188 = vector.multi_reduction <add>, %185, %cst_81 [1] : vector<16x32xf32> to vector<16xf32>
    %189 = vector.shape_cast %188 : vector<16xf32> to vector<16x1xf32>
    %cst_82 = arith.constant 3.200000e+01 : f32
    %190 = vector.broadcast %cst_82 : f32 to vector<16x1xf32>
    %191 = arith.divf %189, %190 : vector<16x1xf32>
    %192 = vector.broadcast %191 : vector<16x1xf32> to vector<16x32xf32>
    %193 = arith.subf %185, %192 : vector<16x32xf32>
    %194 = arith.mulf %193, %193 : vector<16x32xf32>
    %cst_83 = arith.constant dense<0.000000e+00> : vector<16xf32>
    %195 = vector.multi_reduction <add>, %194, %cst_83 [1] : vector<16x32xf32> to vector<16xf32>
    %196 = vector.shape_cast %195 : vector<16xf32> to vector<16x1xf32>
    %cst_84 = arith.constant 3.200000e+01 : f32
    %197 = vector.broadcast %cst_84 : f32 to vector<16x1xf32>
    %198 = arith.divf %196, %197 : vector<16x1xf32>
    %199 = vector.broadcast %191 : vector<16x1xf32> to vector<16x32xf32>
    %200 = arith.subf %185, %199 : vector<16x32xf32>
    %cst_85 = arith.constant 9.99999996E-13 : f32
    %201 = vector.broadcast %cst_85 : f32 to vector<16x1xf32>
    %202 = arith.addf %198, %201 : vector<16x1xf32>
    %203 = math.rsqrt %202 : vector<16x1xf32>
    %204 = vector.broadcast %203 : vector<16x1xf32> to vector<16x32xf32>
    %205 = arith.mulf %200, %204 : vector<16x32xf32>
    %206 = vector.broadcast %186 : vector<1x32xf32> to vector<16x32xf32>
    %207 = arith.mulf %205, %206 : vector<16x32xf32>
    %208 = vector.broadcast %187 : vector<1x32xf32> to vector<16x32xf32>
    %209 = arith.addf %207, %208 : vector<16x32xf32>
    %c0_86 = arith.constant 0 : index
    %c0_87 = arith.constant 0 : index
    %210 = vector.load %arg12[%c0_86, %c0_87] : memref<32x64xf32, #tpu.memory_space<vmem>>, vector<32x64xf32>
    %cst_88 = arith.constant dense<0.000000e+00> : vector<16x64xf32>
    %211 = tpu.matmul %209, %210, %cst_88 {dimension_numbers = #tpu.dot_dimension_numbers<[1], [0], [0], [1], [0, 0, 1, 1], [], []>} : vector<16x32xf32>, vector<32x64xf32>, vector<16x64xf32> -> vector<16x64xf32>
    %c0_89 = arith.constant 0 : index
    %c0_90 = arith.constant 0 : index
    %212 = vector.load %arg13[%c0_89, %c0_90] : memref<1x64xf32, #tpu.memory_space<vmem>>, vector<1x64xf32>
    %213 = vector.broadcast %212 : vector<1x64xf32> to vector<16x64xf32>
    %214 = arith.addf %211, %213 : vector<16x64xf32>
    %215 = arith.mulf %214, %214 : vector<16x64xf32>
    %216 = arith.mulf %214, %215 : vector<16x64xf32>
    %cst_91 = arith.constant 4.471500e-02 : f32
    %217 = vector.broadcast %cst_91 : f32 to vector<16x64xf32>
    %218 = arith.mulf %217, %216 : vector<16x64xf32>
    %219 = arith.addf %214, %218 : vector<16x64xf32>
    %cst_92 = arith.constant 0.797884583 : f32
    %220 = vector.broadcast %cst_92 : f32 to vector<16x64xf32>
    %221 = arith.mulf %220, %219 : vector<16x64xf32>
    %222 = math.tanh %221 : vector<16x64xf32>
    %cst_93 = arith.constant 1.000000e+00 : f32
    %223 = vector.broadcast %cst_93 : f32 to vector<16x64xf32>
    %224 = arith.addf %223, %222 : vector<16x64xf32>
    %cst_94 = arith.constant 5.000000e-01 : f32
    %225 = vector.broadcast %cst_94 : f32 to vector<16x64xf32>
    %226 = arith.mulf %225, %224 : vector<16x64xf32>
    %227 = arith.mulf %214, %226 : vector<16x64xf32>
    %c0_95 = arith.constant 0 : index
    %c0_96 = arith.constant 0 : index
    %228 = vector.load %arg14[%c0_95, %c0_96] : memref<64x32xf32, #tpu.memory_space<vmem>>, vector<64x32xf32>
    %cst_97 = arith.constant dense<0.000000e+00> : vector<16x32xf32>
    %229 = tpu.matmul %227, %228, %cst_97 {dimension_numbers = #tpu.dot_dimension_numbers<[1], [0], [0], [1], [0, 0, 1, 1], [], []>} : vector<16x64xf32>, vector<64x32xf32>, vector<16x32xf32> -> vector<16x32xf32>
    %c0_98 = arith.constant 0 : index
    %c0_99 = arith.constant 0 : index
    %230 = vector.load %arg15[%c0_98, %c0_99] : memref<1x32xf32, #tpu.memory_space<vmem>>, vector<1x32xf32>
    %231 = vector.broadcast %230 : vector<1x32xf32> to vector<16x32xf32>
    %232 = arith.addf %229, %231 : vector<16x32xf32>
    %233 = arith.addf %209, %232 : vector<16x32xf32>
    %c0_100 = arith.constant 0 : index
    %c0_101 = arith.constant 0 : index
    %234 = vector.load %arg16[%c0_100, %c0_101] : memref<1x32xf32, #tpu.memory_space<vmem>>, vector<1x32xf32>
    %c0_102 = arith.constant 0 : index
    %c0_103 = arith.constant 0 : index
    %235 = vector.load %arg17[%c0_102, %c0_103] : memref<1x32xf32, #tpu.memory_space<vmem>>, vector<1x32xf32>
    %cst_104 = arith.constant dense<0.000000e+00> : vector<16xf32>
    %236 = vector.multi_reduction <add>, %233, %cst_104 [1] : vector<16x32xf32> to vector<16xf32>
    %237 = vector.shape_cast %236 : vector<16xf32> to vector<16x1xf32>
    %cst_105 = arith.constant 3.200000e+01 : f32
    %238 = vector.broadcast %cst_105 : f32 to vector<16x1xf32>
    %239 = arith.divf %237, %238 : vector<16x1xf32>
    %240 = vector.broadcast %239 : vector<16x1xf32> to vector<16x32xf32>
    %241 = arith.subf %233, %240 : vector<16x32xf32>
    %242 = arith.mulf %241, %241 : vector<16x32xf32>
    %cst_106 = arith.constant dense<0.000000e+00> : vector<16xf32>
    %243 = vector.multi_reduction <add>, %242, %cst_106 [1] : vector<16x32xf32> to vector<16xf32>
    %244 = vector.shape_cast %243 : vector<16xf32> to vector<16x1xf32>
    %cst_107 = arith.constant 3.200000e+01 : f32
    %245 = vector.broadcast %cst_107 : f32 to vector<16x1xf32>
    %246 = arith.divf %244, %245 : vector<16x1xf32>
    %247 = vector.broadcast %239 : vector<16x1xf32> to vector<16x32xf32>
    %248 = arith.subf %233, %247 : vector<16x32xf32>
    %cst_108 = arith.constant 9.99999996E-13 : f32
    %249 = vector.broadcast %cst_108 : f32 to vector<16x1xf32>
    %250 = arith.addf %246, %249 : vector<16x1xf32>
    %251 = math.rsqrt %250 : vector<16x1xf32>
    %252 = vector.broadcast %251 : vector<16x1xf32> to vector<16x32xf32>
    %253 = arith.mulf %248, %252 : vector<16x32xf32>
    %254 = vector.broadcast %234 : vector<1x32xf32> to vector<16x32xf32>
    %255 = arith.mulf %253, %254 : vector<16x32xf32>
    %256 = vector.broadcast %235 : vector<1x32xf32> to vector<16x32xf32>
    %257 = arith.addf %255, %256 : vector<16x32xf32>
    %c0_109 = arith.constant 0 : index
    %c0_110 = arith.constant 0 : index
    %258 = vector.load %arg18[%c0_109, %c0_110] : memref<16x32xf32, #tpu.memory_space<vmem>>, vector<16x32xf32>
    tpu.vector_store %arg18[%c0_109, %c0_110], %257 {strides = array<i32>} : memref<16x32xf32, #tpu.memory_space<vmem>>, vector<16x32xf32>,
    return
  }
}

module attributes {stable_mosaic.version = 11 : i64} {
  func.func @_lstm_regressor_kernel(%arg0: memref<16x32xf32, #tpu.memory_space<vmem>>, %arg1: memref<32x128xf32, #tpu.memory_space<vmem>>, %arg2: memref<32x128xf32, #tpu.memory_space<vmem>>, %arg3: memref<1x128xf32, #tpu.memory_space<vmem>>, %arg4: memref<32x1xf32, #tpu.memory_space<vmem>>, %arg5: memref<1x1xf32, #tpu.memory_space<vmem>>, %arg6: memref<2x1xf32, #tpu.memory_space<vmem>>) attributes {dimension_semantics = [], scalar_prefetch = 0 : i64, scratch_operands = 0 : i64, tpu.core_type = #tpu.core_type<tc>} {
    %c0 = arith.constant 0 : index
    %c0_0 = arith.constant 0 : index
    %0 = vector.load %arg0[%c0, %c0_0] : memref<16x32xf32, #tpu.memory_space<vmem>>, vector<16x32xf32>
    %c0_1 = arith.constant 0 : index
    %c0_2 = arith.constant 0 : index
    %1 = vector.load %arg1[%c0_1, %c0_2] : memref<32x128xf32, #tpu.memory_space<vmem>>, vector<32x128xf32>
    %cst = arith.constant dense<0.000000e+00> : vector<16x128xf32>
    %2 = tpu.matmul %0, %1, %cst {dimension_numbers = #tpu.dot_dimension_numbers<[1], [0], [0], [1], [0, 0, 1, 1], [], []>} : vector<16x32xf32>, vector<32x128xf32>, vector<16x128xf32> -> vector<16x128xf32>
    %c0_3 = arith.constant 0 : index
    %c0_4 = arith.constant 0 : index
    %3 = vector.load %arg3[%c0_3, %c0_4] : memref<1x128xf32, #tpu.memory_space<vmem>>, vector<1x128xf32>
    %4 = vector.broadcast %3 : vector<1x128xf32> to vector<16x128xf32>
    %5 = arith.addf %2, %4 : vector<16x128xf32>
    %c0_5 = arith.constant 0 : index
    %c0_6 = arith.constant 0 : index
    %6 = vector.load %arg2[%c0_5, %c0_6] : memref<32x128xf32, #tpu.memory_space<vmem>>, vector<32x128xf32>
    %cst_7 = arith.constant 0.000000e+00 : f32
    %7 = vector.broadcast %cst_7 : f32 to vector<2x32xf32>
    %cst_8 = arith.constant 0.000000e+00 : f32
    %8 = vector.broadcast %cst_8 : f32 to vector<2x32xf32>
    %9 = vector.extract_strided_slice %5 {offsets = [0, 0], sizes = [2, 128], strides = [1, 1]} : vector<16x128xf32> to vector<2x128xf32>
    %cst_9 = arith.constant dense<0.000000e+00> : vector<2x128xf32>
    %10 = tpu.matmul %7, %6, %cst_9 {dimension_numbers = #tpu.dot_dimension_numbers<[1], [0], [0], [1], [0, 0, 1, 1], [], []>} : vector<2x32xf32>, vector<32x128xf32>, vector<2x128xf32> -> vector<2x128xf32>
    %11 = arith.addf %9, %10 : vector<2x128xf32>
    %12 = vector.extract_strided_slice %11 {offsets = [0, 0], sizes = [2, 32], strides = [1, 1]} : vector<2x128xf32> to vector<2x32xf32>
    %13 = arith.negf %12 : vector<2x32xf32>
    %14 = math.exp %13 : vector<2x32xf32>
    %cst_10 = arith.constant 1.000000e+00 : f32
    %15 = vector.broadcast %cst_10 : f32 to vector<2x32xf32>
    %16 = arith.addf %15, %14 : vector<2x32xf32>
    %17 = arith.divf %15, %16 : vector<2x32xf32>
    %18 = vector.extract_strided_slice %11 {offsets = [0, 32], sizes = [2, 32], strides = [1, 1]} : vector<2x128xf32> to vector<2x32xf32>
    %19 = arith.negf %18 : vector<2x32xf32>
    %20 = math.exp %19 : vector<2x32xf32>
    %cst_11 = arith.constant 1.000000e+00 : f32
    %21 = vector.broadcast %cst_11 : f32 to vector<2x32xf32>
    %22 = arith.addf %21, %20 : vector<2x32xf32>
    %23 = arith.divf %21, %22 : vector<2x32xf32>
    %24 = vector.extract_strided_slice %11 {offsets = [0, 64], sizes = [2, 32], strides = [1, 1]} : vector<2x128xf32> to vector<2x32xf32>
    %25 = math.tanh %24 : vector<2x32xf32>
    %26 = vector.extract_strided_slice %11 {offsets = [0, 96], sizes = [2, 32], strides = [1, 1]} : vector<2x128xf32> to vector<2x32xf32>
    %27 = arith.negf %26 : vector<2x32xf32>
    %28 = math.exp %27 : vector<2x32xf32>
    %cst_12 = arith.constant 1.000000e+00 : f32
    %29 = vector.broadcast %cst_12 : f32 to vector<2x32xf32>
    %30 = arith.addf %29, %28 : vector<2x32xf32>
    %31 = arith.divf %29, %30 : vector<2x32xf32>
    %32 = arith.mulf %23, %8 : vector<2x32xf32>
    %33 = arith.mulf %17, %25 : vector<2x32xf32>
    %34 = arith.addf %32, %33 : vector<2x32xf32>
    %35 = math.tanh %34 : vector<2x32xf32>
    %36 = arith.mulf %31, %35 : vector<2x32xf32>
    %37 = vector.extract_strided_slice %5 {offsets = [2, 0], sizes = [2, 128], strides = [1, 1]} : vector<16x128xf32> to vector<2x128xf32>
    %cst_13 = arith.constant dense<0.000000e+00> : vector<2x128xf32>
    %38 = tpu.matmul %36, %6, %cst_13 {dimension_numbers = #tpu.dot_dimension_numbers<[1], [0], [0], [1], [0, 0, 1, 1], [], []>} : vector<2x32xf32>, vector<32x128xf32>, vector<2x128xf32> -> vector<2x128xf32>
    %39 = arith.addf %37, %38 : vector<2x128xf32>
    %40 = vector.extract_strided_slice %39 {offsets = [0, 0], sizes = [2, 32], strides = [1, 1]} : vector<2x128xf32> to vector<2x32xf32>
    %41 = arith.negf %40 : vector<2x32xf32>
    %42 = math.exp %41 : vector<2x32xf32>
    %cst_14 = arith.constant 1.000000e+00 : f32
    %43 = vector.broadcast %cst_14 : f32 to vector<2x32xf32>
    %44 = arith.addf %43, %42 : vector<2x32xf32>
    %45 = arith.divf %43, %44 : vector<2x32xf32>
    %46 = vector.extract_strided_slice %39 {offsets = [0, 32], sizes = [2, 32], strides = [1, 1]} : vector<2x128xf32> to vector<2x32xf32>
    %47 = arith.negf %46 : vector<2x32xf32>
    %48 = math.exp %47 : vector<2x32xf32>
    %cst_15 = arith.constant 1.000000e+00 : f32
    %49 = vector.broadcast %cst_15 : f32 to vector<2x32xf32>
    %50 = arith.addf %49, %48 : vector<2x32xf32>
    %51 = arith.divf %49, %50 : vector<2x32xf32>
    %52 = vector.extract_strided_slice %39 {offsets = [0, 64], sizes = [2, 32], strides = [1, 1]} : vector<2x128xf32> to vector<2x32xf32>
    %53 = math.tanh %52 : vector<2x32xf32>
    %54 = vector.extract_strided_slice %39 {offsets = [0, 96], sizes = [2, 32], strides = [1, 1]} : vector<2x128xf32> to vector<2x32xf32>
    %55 = arith.negf %54 : vector<2x32xf32>
    %56 = math.exp %55 : vector<2x32xf32>
    %cst_16 = arith.constant 1.000000e+00 : f32
    %57 = vector.broadcast %cst_16 : f32 to vector<2x32xf32>
    %58 = arith.addf %57, %56 : vector<2x32xf32>
    %59 = arith.divf %57, %58 : vector<2x32xf32>
    %60 = arith.mulf %51, %34 : vector<2x32xf32>
    %61 = arith.mulf %45, %53 : vector<2x32xf32>
    %62 = arith.addf %60, %61 : vector<2x32xf32>
    %63 = math.tanh %62 : vector<2x32xf32>
    %64 = arith.mulf %59, %63 : vector<2x32xf32>
    %65 = vector.extract_strided_slice %5 {offsets = [4, 0], sizes = [2, 128], strides = [1, 1]} : vector<16x128xf32> to vector<2x128xf32>
    %cst_17 = arith.constant dense<0.000000e+00> : vector<2x128xf32>
    %66 = tpu.matmul %64, %6, %cst_17 {dimension_numbers = #tpu.dot_dimension_numbers<[1], [0], [0], [1], [0, 0, 1, 1], [], []>} : vector<2x32xf32>, vector<32x128xf32>, vector<2x128xf32> -> vector<2x128xf32>
    %67 = arith.addf %65, %66 : vector<2x128xf32>
    %68 = vector.extract_strided_slice %67 {offsets = [0, 0], sizes = [2, 32], strides = [1, 1]} : vector<2x128xf32> to vector<2x32xf32>
    %69 = arith.negf %68 : vector<2x32xf32>
    %70 = math.exp %69 : vector<2x32xf32>
    %cst_18 = arith.constant 1.000000e+00 : f32
    %71 = vector.broadcast %cst_18 : f32 to vector<2x32xf32>
    %72 = arith.addf %71, %70 : vector<2x32xf32>
    %73 = arith.divf %71, %72 : vector<2x32xf32>
    %74 = vector.extract_strided_slice %67 {offsets = [0, 32], sizes = [2, 32], strides = [1, 1]} : vector<2x128xf32> to vector<2x32xf32>
    %75 = arith.negf %74 : vector<2x32xf32>
    %76 = math.exp %75 : vector<2x32xf32>
    %cst_19 = arith.constant 1.000000e+00 : f32
    %77 = vector.broadcast %cst_19 : f32 to vector<2x32xf32>
    %78 = arith.addf %77, %76 : vector<2x32xf32>
    %79 = arith.divf %77, %78 : vector<2x32xf32>
    %80 = vector.extract_strided_slice %67 {offsets = [0, 64], sizes = [2, 32], strides = [1, 1]} : vector<2x128xf32> to vector<2x32xf32>
    %81 = math.tanh %80 : vector<2x32xf32>
    %82 = vector.extract_strided_slice %67 {offsets = [0, 96], sizes = [2, 32], strides = [1, 1]} : vector<2x128xf32> to vector<2x32xf32>
    %83 = arith.negf %82 : vector<2x32xf32>
    %84 = math.exp %83 : vector<2x32xf32>
    %cst_20 = arith.constant 1.000000e+00 : f32
    %85 = vector.broadcast %cst_20 : f32 to vector<2x32xf32>
    %86 = arith.addf %85, %84 : vector<2x32xf32>
    %87 = arith.divf %85, %86 : vector<2x32xf32>
    %88 = arith.mulf %79, %62 : vector<2x32xf32>
    %89 = arith.mulf %73, %81 : vector<2x32xf32>
    %90 = arith.addf %88, %89 : vector<2x32xf32>
    %91 = math.tanh %90 : vector<2x32xf32>
    %92 = arith.mulf %87, %91 : vector<2x32xf32>
    %93 = vector.extract_strided_slice %5 {offsets = [6, 0], sizes = [2, 128], strides = [1, 1]} : vector<16x128xf32> to vector<2x128xf32>
    %cst_21 = arith.constant dense<0.000000e+00> : vector<2x128xf32>
    %94 = tpu.matmul %92, %6, %cst_21 {dimension_numbers = #tpu.dot_dimension_numbers<[1], [0], [0], [1], [0, 0, 1, 1], [], []>} : vector<2x32xf32>, vector<32x128xf32>, vector<2x128xf32> -> vector<2x128xf32>
    %95 = arith.addf %93, %94 : vector<2x128xf32>
    %96 = vector.extract_strided_slice %95 {offsets = [0, 0], sizes = [2, 32], strides = [1, 1]} : vector<2x128xf32> to vector<2x32xf32>
    %97 = arith.negf %96 : vector<2x32xf32>
    %98 = math.exp %97 : vector<2x32xf32>
    %cst_22 = arith.constant 1.000000e+00 : f32
    %99 = vector.broadcast %cst_22 : f32 to vector<2x32xf32>
    %100 = arith.addf %99, %98 : vector<2x32xf32>
    %101 = arith.divf %99, %100 : vector<2x32xf32>
    %102 = vector.extract_strided_slice %95 {offsets = [0, 32], sizes = [2, 32], strides = [1, 1]} : vector<2x128xf32> to vector<2x32xf32>
    %103 = arith.negf %102 : vector<2x32xf32>
    %104 = math.exp %103 : vector<2x32xf32>
    %cst_23 = arith.constant 1.000000e+00 : f32
    %105 = vector.broadcast %cst_23 : f32 to vector<2x32xf32>
    %106 = arith.addf %105, %104 : vector<2x32xf32>
    %107 = arith.divf %105, %106 : vector<2x32xf32>
    %108 = vector.extract_strided_slice %95 {offsets = [0, 64], sizes = [2, 32], strides = [1, 1]} : vector<2x128xf32> to vector<2x32xf32>
    %109 = math.tanh %108 : vector<2x32xf32>
    %110 = vector.extract_strided_slice %95 {offsets = [0, 96], sizes = [2, 32], strides = [1, 1]} : vector<2x128xf32> to vector<2x32xf32>
    %111 = arith.negf %110 : vector<2x32xf32>
    %112 = math.exp %111 : vector<2x32xf32>
    %cst_24 = arith.constant 1.000000e+00 : f32
    %113 = vector.broadcast %cst_24 : f32 to vector<2x32xf32>
    %114 = arith.addf %113, %112 : vector<2x32xf32>
    %115 = arith.divf %113, %114 : vector<2x32xf32>
    %116 = arith.mulf %107, %90 : vector<2x32xf32>
    %117 = arith.mulf %101, %109 : vector<2x32xf32>
    %118 = arith.addf %116, %117 : vector<2x32xf32>
    %119 = math.tanh %118 : vector<2x32xf32>
    %120 = arith.mulf %115, %119 : vector<2x32xf32>
    %121 = vector.extract_strided_slice %5 {offsets = [8, 0], sizes = [2, 128], strides = [1, 1]} : vector<16x128xf32> to vector<2x128xf32>
    %cst_25 = arith.constant dense<0.000000e+00> : vector<2x128xf32>
    %122 = tpu.matmul %120, %6, %cst_25 {dimension_numbers = #tpu.dot_dimension_numbers<[1], [0], [0], [1], [0, 0, 1, 1], [], []>} : vector<2x32xf32>, vector<32x128xf32>, vector<2x128xf32> -> vector<2x128xf32>
    %123 = arith.addf %121, %122 : vector<2x128xf32>
    %124 = vector.extract_strided_slice %123 {offsets = [0, 0], sizes = [2, 32], strides = [1, 1]} : vector<2x128xf32> to vector<2x32xf32>
    %125 = arith.negf %124 : vector<2x32xf32>
    %126 = math.exp %125 : vector<2x32xf32>
    %cst_26 = arith.constant 1.000000e+00 : f32
    %127 = vector.broadcast %cst_26 : f32 to vector<2x32xf32>
    %128 = arith.addf %127, %126 : vector<2x32xf32>
    %129 = arith.divf %127, %128 : vector<2x32xf32>
    %130 = vector.extract_strided_slice %123 {offsets = [0, 32], sizes = [2, 32], strides = [1, 1]} : vector<2x128xf32> to vector<2x32xf32>
    %131 = arith.negf %130 : vector<2x32xf32>
    %132 = math.exp %131 : vector<2x32xf32>
    %cst_27 = arith.constant 1.000000e+00 : f32
    %133 = vector.broadcast %cst_27 : f32 to vector<2x32xf32>
    %134 = arith.addf %133, %132 : vector<2x32xf32>
    %135 = arith.divf %133, %134 : vector<2x32xf32>
    %136 = vector.extract_strided_slice %123 {offsets = [0, 64], sizes = [2, 32], strides = [1, 1]} : vector<2x128xf32> to vector<2x32xf32>
    %137 = math.tanh %136 : vector<2x32xf32>
    %138 = vector.extract_strided_slice %123 {offsets = [0, 96], sizes = [2, 32], strides = [1, 1]} : vector<2x128xf32> to vector<2x32xf32>
    %139 = arith.negf %138 : vector<2x32xf32>
    %140 = math.exp %139 : vector<2x32xf32>
    %cst_28 = arith.constant 1.000000e+00 : f32
    %141 = vector.broadcast %cst_28 : f32 to vector<2x32xf32>
    %142 = arith.addf %141, %140 : vector<2x32xf32>
    %143 = arith.divf %141, %142 : vector<2x32xf32>
    %144 = arith.mulf %135, %118 : vector<2x32xf32>
    %145 = arith.mulf %129, %137 : vector<2x32xf32>
    %146 = arith.addf %144, %145 : vector<2x32xf32>
    %147 = math.tanh %146 : vector<2x32xf32>
    %148 = arith.mulf %143, %147 : vector<2x32xf32>
    %149 = vector.extract_strided_slice %5 {offsets = [10, 0], sizes = [2, 128], strides = [1, 1]} : vector<16x128xf32> to vector<2x128xf32>
    %cst_29 = arith.constant dense<0.000000e+00> : vector<2x128xf32>
    %150 = tpu.matmul %148, %6, %cst_29 {dimension_numbers = #tpu.dot_dimension_numbers<[1], [0], [0], [1], [0, 0, 1, 1], [], []>} : vector<2x32xf32>, vector<32x128xf32>, vector<2x128xf32> -> vector<2x128xf32>
    %151 = arith.addf %149, %150 : vector<2x128xf32>
    %152 = vector.extract_strided_slice %151 {offsets = [0, 0], sizes = [2, 32], strides = [1, 1]} : vector<2x128xf32> to vector<2x32xf32>
    %153 = arith.negf %152 : vector<2x32xf32>
    %154 = math.exp %153 : vector<2x32xf32>
    %cst_30 = arith.constant 1.000000e+00 : f32
    %155 = vector.broadcast %cst_30 : f32 to vector<2x32xf32>
    %156 = arith.addf %155, %154 : vector<2x32xf32>
    %157 = arith.divf %155, %156 : vector<2x32xf32>
    %158 = vector.extract_strided_slice %151 {offsets = [0, 32], sizes = [2, 32], strides = [1, 1]} : vector<2x128xf32> to vector<2x32xf32>
    %159 = arith.negf %158 : vector<2x32xf32>
    %160 = math.exp %159 : vector<2x32xf32>
    %cst_31 = arith.constant 1.000000e+00 : f32
    %161 = vector.broadcast %cst_31 : f32 to vector<2x32xf32>
    %162 = arith.addf %161, %160 : vector<2x32xf32>
    %163 = arith.divf %161, %162 : vector<2x32xf32>
    %164 = vector.extract_strided_slice %151 {offsets = [0, 64], sizes = [2, 32], strides = [1, 1]} : vector<2x128xf32> to vector<2x32xf32>
    %165 = math.tanh %164 : vector<2x32xf32>
    %166 = vector.extract_strided_slice %151 {offsets = [0, 96], sizes = [2, 32], strides = [1, 1]} : vector<2x128xf32> to vector<2x32xf32>
    %167 = arith.negf %166 : vector<2x32xf32>
    %168 = math.exp %167 : vector<2x32xf32>
    %cst_32 = arith.constant 1.000000e+00 : f32
    %169 = vector.broadcast %cst_32 : f32 to vector<2x32xf32>
    %170 = arith.addf %169, %168 : vector<2x32xf32>
    %171 = arith.divf %169, %170 : vector<2x32xf32>
    %172 = arith.mulf %163, %146 : vector<2x32xf32>
    %173 = arith.mulf %157, %165 : vector<2x32xf32>
    %174 = arith.addf %172, %173 : vector<2x32xf32>
    %175 = math.tanh %174 : vector<2x32xf32>
    %176 = arith.mulf %171, %175 : vector<2x32xf32>
    %177 = vector.extract_strided_slice %5 {offsets = [12, 0], sizes = [2, 128], strides = [1, 1]} : vector<16x128xf32> to vector<2x128xf32>
    %cst_33 = arith.constant dense<0.000000e+00> : vector<2x128xf32>
    %178 = tpu.matmul %176, %6, %cst_33 {dimension_numbers = #tpu.dot_dimension_numbers<[1], [0], [0], [1], [0, 0, 1, 1], [], []>} : vector<2x32xf32>, vector<32x128xf32>, vector<2x128xf32> -> vector<2x128xf32>
    %179 = arith.addf %177, %178 : vector<2x128xf32>
    %180 = vector.extract_strided_slice %179 {offsets = [0, 0], sizes = [2, 32], strides = [1, 1]} : vector<2x128xf32> to vector<2x32xf32>
    %181 = arith.negf %180 : vector<2x32xf32>
    %182 = math.exp %181 : vector<2x32xf32>
    %cst_34 = arith.constant 1.000000e+00 : f32
    %183 = vector.broadcast %cst_34 : f32 to vector<2x32xf32>
    %184 = arith.addf %183, %182 : vector<2x32xf32>
    %185 = arith.divf %183, %184 : vector<2x32xf32>
    %186 = vector.extract_strided_slice %179 {offsets = [0, 32], sizes = [2, 32], strides = [1, 1]} : vector<2x128xf32> to vector<2x32xf32>
    %187 = arith.negf %186 : vector<2x32xf32>
    %188 = math.exp %187 : vector<2x32xf32>
    %cst_35 = arith.constant 1.000000e+00 : f32
    %189 = vector.broadcast %cst_35 : f32 to vector<2x32xf32>
    %190 = arith.addf %189, %188 : vector<2x32xf32>
    %191 = arith.divf %189, %190 : vector<2x32xf32>
    %192 = vector.extract_strided_slice %179 {offsets = [0, 64], sizes = [2, 32], strides = [1, 1]} : vector<2x128xf32> to vector<2x32xf32>
    %193 = math.tanh %192 : vector<2x32xf32>
    %194 = vector.extract_strided_slice %179 {offsets = [0, 96], sizes = [2, 32], strides = [1, 1]} : vector<2x128xf32> to vector<2x32xf32>
    %195 = arith.negf %194 : vector<2x32xf32>
    %196 = math.exp %195 : vector<2x32xf32>
    %cst_36 = arith.constant 1.000000e+00 : f32
    %197 = vector.broadcast %cst_36 : f32 to vector<2x32xf32>
    %198 = arith.addf %197, %196 : vector<2x32xf32>
    %199 = arith.divf %197, %198 : vector<2x32xf32>
    %200 = arith.mulf %191, %174 : vector<2x32xf32>
    %201 = arith.mulf %185, %193 : vector<2x32xf32>
    %202 = arith.addf %200, %201 : vector<2x32xf32>
    %203 = math.tanh %202 : vector<2x32xf32>
    %204 = arith.mulf %199, %203 : vector<2x32xf32>
    %205 = vector.extract_strided_slice %5 {offsets = [14, 0], sizes = [2, 128], strides = [1, 1]} : vector<16x128xf32> to vector<2x128xf32>
    %cst_37 = arith.constant dense<0.000000e+00> : vector<2x128xf32>
    %206 = tpu.matmul %204, %6, %cst_37 {dimension_numbers = #tpu.dot_dimension_numbers<[1], [0], [0], [1], [0, 0, 1, 1], [], []>} : vector<2x32xf32>, vector<32x128xf32>, vector<2x128xf32> -> vector<2x128xf32>
    %207 = arith.addf %205, %206 : vector<2x128xf32>
    %208 = vector.extract_strided_slice %207 {offsets = [0, 0], sizes = [2, 32], strides = [1, 1]} : vector<2x128xf32> to vector<2x32xf32>
    %209 = arith.negf %208 : vector<2x32xf32>
    %210 = math.exp %209 : vector<2x32xf32>
    %cst_38 = arith.constant 1.000000e+00 : f32
    %211 = vector.broadcast %cst_38 : f32 to vector<2x32xf32>
    %212 = arith.addf %211, %210 : vector<2x32xf32>
    %213 = arith.divf %211, %212 : vector<2x32xf32>
    %214 = vector.extract_strided_slice %207 {offsets = [0, 32], sizes = [2, 32], strides = [1, 1]} : vector<2x128xf32> to vector<2x32xf32>
    %215 = arith.negf %214 : vector<2x32xf32>
    %216 = math.exp %215 : vector<2x32xf32>
    %cst_39 = arith.constant 1.000000e+00 : f32
    %217 = vector.broadcast %cst_39 : f32 to vector<2x32xf32>
    %218 = arith.addf %217, %216 : vector<2x32xf32>
    %219 = arith.divf %217, %218 : vector<2x32xf32>
    %220 = vector.extract_strided_slice %207 {offsets = [0, 64], sizes = [2, 32], strides = [1, 1]} : vector<2x128xf32> to vector<2x32xf32>
    %221 = math.tanh %220 : vector<2x32xf32>
    %222 = vector.extract_strided_slice %207 {offsets = [0, 96], sizes = [2, 32], strides = [1, 1]} : vector<2x128xf32> to vector<2x32xf32>
    %223 = arith.negf %222 : vector<2x32xf32>
    %224 = math.exp %223 : vector<2x32xf32>
    %cst_40 = arith.constant 1.000000e+00 : f32
    %225 = vector.broadcast %cst_40 : f32 to vector<2x32xf32>
    %226 = arith.addf %225, %224 : vector<2x32xf32>
    %227 = arith.divf %225, %226 : vector<2x32xf32>
    %228 = arith.mulf %219, %202 : vector<2x32xf32>
    %229 = arith.mulf %213, %221 : vector<2x32xf32>
    %230 = arith.addf %228, %229 : vector<2x32xf32>
    %231 = math.tanh %230 : vector<2x32xf32>
    %232 = arith.mulf %227, %231 : vector<2x32xf32>
    %c0_41 = arith.constant 0 : index
    %c0_42 = arith.constant 0 : index
    %233 = vector.load %arg4[%c0_41, %c0_42] : memref<32x1xf32, #tpu.memory_space<vmem>>, vector<32x1xf32>
    %cst_43 = arith.constant dense<0.000000e+00> : vector<2x1xf32>
    %234 = tpu.matmul %232, %233, %cst_43 {dimension_numbers = #tpu.dot_dimension_numbers<[1], [0], [0], [1], [0, 0, 1, 1], [], []>} : vector<2x32xf32>, vector<32x1xf32>, vector<2x1xf32> -> vector<2x1xf32>
    %c0_44 = arith.constant 0 : index
    %c0_45 = arith.constant 0 : index
    %235 = vector.load %arg5[%c0_44, %c0_45] : memref<1x1xf32, #tpu.memory_space<vmem>>, vector<1x1xf32>
    %236 = vector.broadcast %235 : vector<1x1xf32> to vector<2x1xf32>
    %237 = arith.addf %234, %236 : vector<2x1xf32>
    %c0_46 = arith.constant 0 : index
    %c0_47 = arith.constant 0 : index
    %238 = vector.load %arg6[%c0_46, %c0_47] : memref<2x1xf32, #tpu.memory_space<vmem>>, vector<2x1xf32>
    tpu.vector_store %arg6[%c0_46, %c0_47], %237 {strides = array<i32>} : memref<2x1xf32, #tpu.memory_space<vmem>>, vector<2x1xf32>,
    return
  }
}

</mosaic_0001>

<bundles_post_ra>
// kernel: classification_forward.4
= control target key start
LH: loop header
LB: loop body
LE: loop exit
PB: predicated region body
PF: predicated region fallthrough
CT: control target
= control target key end

     0   :  { %vm18_vm0 = vcmask 261120   ;;  %s118_s0 = inlined_call_operand.vmem [shape: f32[16,32], index: 0, kind: input, shape index: {}]   ;;  %s119_s1 = inlined_call_operand.vmem [shape: f32[1,32], index: 1, kind: input, shape index: {}]   ;;  %s120_s2 = inlined_call_operand.vmem [shape: f32[1,32], index: 2, kind: input, shape index: {}]   ;;  %s121_s3 = inlined_call_operand.vmem [shape: f32[16,32], index: 3, kind: output, shape index: {}]  }
   0x1   :  { %v14_v0 = vld [vmem:[%s118_s0] sm:$0xff]  ;;  %v15_v1 = vld [vmem:[%s118_s0 + $0x8] sm:$0xff] }
   0x2   :  { %v19_v2 = vsel %vm18_vm0, %v14_v0, 0.0  ;;  %v22_v3 = vsel %vm18_vm0, %v15_v1, 0.0  ;;  %v68_v21 = vld [vmem:[%s119_s1] ss:$0 sm:$0xff] }
   0x3   :  { %20 = vadd.xlane.f32.xlu0 %v19_v2  ;;  %v69_v23 = vld [vmem:[%s120_s2] ss:$0 sm:$0xff] }
   0x7   :  { %23 = vadd.xlane.f32.xlu0 %v22_v3 }
  0x90   :  { %v21_v4 = vpop.xlane.xlu0 %20 }
  0x91   :  { %v26_v5 = vmul.f32 0.03125, %v21_v4 }
  0x93   :  { %v28_v6 = vsub.f32 %v14_v0, %v26_v5 }
  0x94   :  { %v24_v7 = vpop.xlane.xlu0 %23 }
  0x95   :  { %v27_v8 = vmul.f32 0.03125, %v24_v7  ;;  %v30_v9 = vmul.f32 %v28_v6, %v28_v6 }
  0x97   :  { %v29_v10 = vsub.f32 %v15_v1, %v27_v8  ;;  %v32_v11 = vsel %vm18_vm0, %v30_v9, 0.0 }
  0x98   :  { %33 = vadd.xlane.f32.xlu1 %v32_v11 }
  0x99   :  { %v31_v12 = vmul.f32 %v29_v10, %v29_v10 }
  0x9b   :  { %v35_v13 = vsel %vm18_vm0, %v31_v12, 0.0 }
  0x9c   :  { %36 = vadd.xlane.f32.xlu1 %v35_v13 }
 0x125   :  { %v34_v14 = vpop.xlane.xlu1 %33 }
 0x126   :  { %v38_v15 = vmul.f32 0.03125, %v34_v14 }
 0x128   :  { %v40_v16 = vadd.f32 1e-12, %v38_v15 }
 0x129   :  { %v37_v17 = vpop.xlane.xlu1 %36 }
 0x12a   :  { %70 = vrsqrt.f32 %v40_v16  ;;  %v39_v18 = vmul.f32 0.03125, %v37_v17 }
 0x12c   :  { %v41_v19 = vadd.f32 1e-12, %v39_v18 }
 0x12e   :  { %72 = vrsqrt.f32 %v41_v19 }
 0x134   :  { %v71_v20 = vpop.eup %70 }
 0x135   :  { %v44_v22 = vmul.f32 %v71_v20, %v28_v6 }
 0x137   :  { %v52_v24 = vmul.f32 %v68_v21, %v44_v22 }
 0x138   :  { %v73_v25 = vpop.eup %72 }
 0x139   :  { %v60_v26 = vadd.f32 %v69_v23, %v52_v24  ;;  %v45_v27 = vmul.f32 %v73_v25, %v29_v10 }
 0x13b   :  { %62 = vst.msk [vmem:[%s121_s3] sm:$0xff] %vm18_vm0, %v60_v26  ;;  %v53_v28 = vmul.f32 %v68_v21, %v45_v27 }
 0x13d   :  { %v61_v29 = vadd.f32 %v69_v23, %v53_v28 }
 0x13f   :  { %63 = vst.msk [vmem:[%s121_s3 + $0x8] sm:$0xff] %vm18_vm0, %v61_v29 }

// kernel: classification_forward.7
= control target key start
LH: loop header
LB: loop body
LE: loop exit
PB: predicated region body
PF: predicated region fallthrough
CT: control target
= control target key end

     0   :  { %v1371_v2 = vmov 0.0|0.0   ;;  %vm38_vm0 = vcmask 261120   ;;  %vm1372_vm1 = vmmov 0   ;;  %v1373_v4 = vmov 0.0   ;;  %s1374_s16 = smov 64   ;;  %s1573_s1 = inlined_call_operand.vmem [shape: f32[32,128], index: 1, kind: input, shape index: {}]   ;;  %s1574_s2 = inlined_call_operand.vmem [shape: f32[32,128], index: 2, kind: input, shape index: {}]   ;;  %s1575_s0 = inlined_call_operand.vmem [shape: f32[16,32], index: 0, kind: input, shape index: {}]   ;;  %s1576_s3 = inlined_call_operand.vmem [shape: f32[1,128], index: 3, kind: input, shape index: {}]   ;;  %s1577_s4 = inlined_call_operand.vmem [shape: f32[32,1], index: 4, kind: input, shape index: {}]   ;;  %s1578_s5 = inlined_call_operand.<no memory space> [shape: f32[1,1], index: 5, kind: input, shape index: {}]   ;;  %s1579_s6 = inlined_call_operand.vmem [shape: f32[2,1], index: 6, kind: output, shape index: {}]  }
   0x1   :  { %v27_v0 = vld [vmem:[%s1573_s1] sm:$0xff]  ;;  %v28_v1 = vld [vmem:[%s1573_s1 + $0x8] sm:$0xff]  ;;  %1248 = vmatprep.subr.bf16.mxu1 %v1371_v2  ;;  %1149 = vmatprep.mubr.msk.f32.mxu1 %vm1372_vm1, %v1373_v4  ;;  %v29_v7 = vld [vmem:[%s1573_s1 + $0x10] sm:$0xff]  ;;  %vm1053_vm2 = vcmask 1024  }
   0x2   :  { %v120_v3 = vld [vmem:[%s1574_s2] sm:$0xff]  ;;  %v1240_v5 = vpack.c.bf16 %v28_v1, %v27_v0  ;;  %v121_v6 = vld [vmem:[%s1574_s2 + $0x8] sm:$0xff]  ;;  %v30_v8 = vld [vmem:[%s1573_s1 + $0x18] sm:$0xff] }
   0x3   :  { %v1432_v9 = vpack.c.bf16 %v121_v6, %v120_v3  ;;  %v1244_v10 = vpack.c.bf16 %v30_v8, %v29_v7  ;;  %v25_v11 = vld [vmem:[%s1575_s0] sm:$0xff]  ;;  %v122_v12 = vld [vmem:[%s1574_s2 + $0x10] sm:$0xff]  ;;  %v123_v13 = vld [vmem:[%s1574_s2 + $0x18] sm:$0xff] }
   0x4   :  { %1241 = vmatprep.subr.bf16.mxu0 %v1240_v5  ;;  %1138 = vmatprep.mubr.msk.f32.mxu0 %vm38_vm0, %v25_v11  ;;  %v1445_v14 = vpack.c.bf16 %v123_v13, %v122_v12  ;;  %v26_v15 = vld [vmem:[%s1575_s0 + $0x8] sm:$0xff]  ;;  %v1059_v16 = vld [vmem:[%s1576_s3] ss:$0 sm:$0xff]  ;;  %s1375_s3 = smov 32  }
   0x5   :  { %1243 = vmatpush3.bf16.msra.mxu0 %v1240_v5  ;;  %1250 = vmatpush3.bf16.msra.mxu1 %v1432_v9 }
   0x6   :  { %1245 = vmatprep.subr.bf16.mxu0 %v1244_v10  ;;  %1251 = vmatprep.subr.bf16.mxu1 %v1371_v2 }
   0x9   :  { %1247 = vmatpush3.bf16.msra.mxu0 %v1244_v10  ;;  %1253 = vmatpush3.bf16.msra.mxu1 %v1445_v14 }
   0xa   :  { %1254 = vmatprep.subr.bf16.mxu0 %v1371_v2  ;;  %1260 = vmatprep.subr.bf16.mxu1 %v1371_v2 }
   0xc   :  { %1139 = vmatmul.mubr.msk.f32.vlgmr.msra.gmra.mrb[0].mxu0 %vm38_vm0, %v26_v15  ;;  %1150 = vmatmul.mubr.f32.vlgmr.msra.gmra.mrb[0].mxu1 %v1373_v4 }
   0xd   :  { %1256 = vmatpush3.bf16.msra.mxu0 %v1432_v9  ;;  %1160 = vmatprep.mubr.msk.f32.mxu0 %vm1372_vm1, %v1373_v4 }
   0xe   :  { %1257 = vmatprep.subr.bf16.mxu0 %v1371_v2  ;;  %1262 = vmatpush3.bf16.msra.mxu1 %v1432_v9 }
   0xf   :  { %1263 = vmatprep.subr.bf16.mxu1 %v1371_v2  ;;  %1171 = vmatprep.mubr.msk.f32.mxu1 %vm1372_vm1, %v1373_v4 }
  0x11   :  { %1259 = vmatpush3.bf16.msra.mxu0 %v1445_v14 }
  0x12   :  { %1265 = vmatpush3.bf16.msra.mxu1 %v1445_v14  ;;  %1266 = vmatprep.subr.bf16.mxu0 %v1371_v2 }
  0x13   :  { %1272 = vmatprep.subr.bf16.mxu1 %v1371_v2 }
  0xdf   :  { %v1140_v17 = vpop.f32.mrb[0].mxu0  ;;  %v193_v18 = vpop.f32.mrb[0].mxu1 }
  0xe0   :  { %v1471_v19 = vadd.f32 %v1140_v17, %v1059_v16  ;;  %v111_v20 = vpop.f32.mrb[1].mxu0  ;;  %v1151_v21 = vpop.f32.mrb[1].mxu1 }
  0xe1   :  { %v1473_v22 = vadd.f32 %v1059_v16, %v111_v20 }
  0xe3   :  { %v197_v23 = vadd.f32 %v193_v18, %v1473_v22 }
  0xe5   :  { %1307 = vtanh.f32 %v197_v23  ;;  %v1062_v25 = vmul.f32 -1.442695, %v197_v23 }
  0xe7   :  { %1309 = vpow2.f32 %v1062_v25 }
  0xef   :  { %v1308_v24 = vpop.eup %1307 }
  0xf0   :  { %207 = vrot.lane.b32.xlu0 %v1308_v24, %s1374_s16 }
  0xf1   :  { %v1310_v26 = vpop.eup %1309 }
  0xf2   :  { %v201_v27 = vadd.f32 1.0, %v1310_v26 }
  0xf4   :  { %1311 = vrcp.f32 %v201_v27 }
  0xfe   :  { %v1312_v28 = vpop.eup %1311 }
  0xff   :  { %v205_v31 = vmul.f32 0.0, %v1312_v28 }
 0x162   :  { %v208_v29 = vpop.permute.xlu0 %207 }
 0x163   :  { %v210_v30 = vmul.f32 %v1312_v28, %v208_v29 }
 0x165   :  { %212 = vrot.lane.b32.xlu0 %v210_v30, %s1375_s3 }
 0x1d7   :  { %v213_v32 = vpop.permute.xlu0 %212 }
 0x1d8   :  { %v215_v33 = vadd.f32 %v213_v32, %v205_v31 }
 0x1da   :  { %1313 = vtanh.f32 %v215_v33  ;;  %v309_v49 = vrot.slane %v215_v33, 6 }
 0x1e4   :  { %v1314_v34 = vpop.eup %1313 }
 0x1e5   :  { %218 = vrot.lane.b32.xlu1 %v1314_v34, %s1374_s16 }
 0x257   :  { %v219_v35 = vpop.permute.xlu1 %218 }
 0x258   :  { %v221_v36 = vmul.f32 %v1312_v28, %v219_v35 }
 0x25a   :  { %223 = vrot.lane.b32.xlu1 %v221_v36, %s1375_s3 }
 0x2cc   :  { %v224_v37 = vpop.permute.xlu1 %223 }
 0x2cd   :  { %1161 = vmatmul.mubr.msk.f32.vlgmr.msra.gmra.mrb[2].mxu0 %vm38_vm0, %v224_v37 }
 0x2ce   :  { %1268 = vmatpush3.bf16.msra.mxu0 %v1432_v9  ;;  %1182 = vmatprep.mubr.msk.f32.mxu0 %vm1372_vm1, %v1373_v4 }
 0x2cf   :  { %1269 = vmatprep.subr.bf16.mxu0 %v1371_v2 }
 0x2d2   :  { %1271 = vmatpush3.bf16.msra.mxu0 %v1445_v14 }
 0x2d3   :  { %1278 = vmatprep.subr.bf16.mxu0 %v1371_v2 }
 0x3a0   :  { %v293_v38 = vpop.f32.mrb[2].mxu0 }
 0x3a1   :  { %v298_v39 = vrot.slane %v293_v38, 6  ;;  %v1162_v40 = vpop.f32.mrb[3].mxu0 }
 0x3a3   :  { %v300_v41 = vadd.f32 %v298_v39, %v1473_v22 }
 0x3a5   :  { %1315 = vtanh.f32 %v300_v41  ;;  %v1064_v43 = vmul.f32 -1.442695, %v300_v41 }
 0x3a7   :  { %1317 = vpow2.f32 %v1064_v43 }
 0x3af   :  { %v1316_v42 = vpop.eup %1315 }
 0x3b0   :  { %313 = vrot.lane.b32.xlu0 %v1316_v42, %s1374_s16 }
 0x3b1   :  { %v1318_v44 = vpop.eup %1317 }
 0x3b2   :  { %v304_v45 = vadd.f32 1.0, %v1318_v44 }
 0x3b4   :  { %1319 = vrcp.f32 %v304_v45 }
 0x3be   :  { %v1320_v46 = vpop.eup %1319 }
 0x3bf   :  { %v311_v50 = vmul.f32 %v1320_v46, %v309_v49 }
 0x422   :  { %v314_v47 = vpop.permute.xlu0 %313 }
 0x423   :  { %v316_v48 = vmul.f32 %v1320_v46, %v314_v47 }
 0x425   :  { %318 = vrot.lane.b32.xlu1 %v316_v48, %s1375_s3 }
 0x497   :  { %v319_v51 = vpop.permute.xlu1 %318 }
 0x498   :  { %v321_v52 = vadd.f32 %v319_v51, %v311_v50 }
 0x49a   :  { %1321 = vtanh.f32 %v321_v52  ;;  %v416_v7 = vrot.slane %v321_v52, 6 }
 0x4a4   :  { %v1322_v53 = vpop.eup %1321 }
 0x4a5   :  { %324 = vrot.lane.b32.xlu0 %v1322_v53, %s1374_s16 }
 0x517   :  { %v325_v54 = vpop.permute.xlu0 %324 }
 0x518   :  { %v327_v55 = vmul.f32 %v1320_v46, %v325_v54 }
 0x51a   :  { %v329_v56 = vrot.slane %v327_v55, 2 }
 0x51c   :  { %330 = vrot.lane.b32.xlu1 %v329_v56, %s1375_s3 }
 0x58e   :  { %v331_v57 = vpop.permute.xlu1 %330 }
 0x58f   :  { %1172 = vmatmul.mubr.msk.f32.vlgmr.msra.gmra.mrb[2].mxu1 %vm38_vm0, %v331_v57 }
 0x590   :  { %1274 = vmatpush3.bf16.msra.mxu1 %v1432_v9  ;;  %1193 = vmatprep.mubr.msk.f32.mxu1 %vm1372_vm1, %v1373_v4 }
 0x591   :  { %1275 = vmatprep.subr.bf16.mxu1 %v1371_v2 }
 0x594   :  { %1277 = vmatpush3.bf16.msra.mxu1 %v1445_v14 }
 0x595   :  { %1284 = vmatprep.subr.bf16.mxu1 %v1371_v2 }
 0x662   :  { %v400_v58 = vpop.f32.mrb[2].mxu1 }
 0x663   :  { %v405_v59 = vrot.slane %v400_v58, 4  ;;  %v1173_v60 = vpop.f32.mrb[3].mxu1 }
 0x665   :  { %v407_v61 = vadd.f32 %v405_v59, %v1473_v22 }
 0x667   :  { %1323 = vtanh.f32 %v407_v61  ;;  %v1066_v63 = vmul.f32 -1.442695, %v407_v61 }
 0x669   :  { %1325 = vpow2.f32 %v1066_v63 }
 0x671   :  { %v1324_v62 = vpop.eup %1323 }
 0x672   :  { %420 = vrot.lane.b32.xlu0 %v1324_v62, %s1374_s16 }
 0x673   :  { %v1326_v0 = vpop.eup %1325 }
 0x674   :  { %v411_v1 = vadd.f32 1.0, %v1326_v0 }
 0x676   :  { %1327 = vrcp.f32 %v411_v1 }
 0x680   :  { %v1328_v3 = vpop.eup %1327 }
 0x681   :  { %v418_v8 = vmul.f32 %v1328_v3, %v416_v7 }
 0x6e4   :  { %v421_v5 = vpop.permute.xlu0 %420 }
 0x6e5   :  { %v423_v6 = vmul.f32 %v1328_v3, %v421_v5 }
 0x6e7   :  { %425 = vrot.lane.b32.xlu1 %v423_v6, %s1375_s3 }
 0x759   :  { %v426_v10 = vpop.permute.xlu1 %425 }
 0x75a   :  { %v428_v11 = vadd.f32 %v426_v10, %v418_v8 }
 0x75c   :  { %1329 = vtanh.f32 %v428_v11  ;;  %v523_v31 = vrot.slane %v428_v11, 6 }
 0x766   :  { %v1330_v12 = vpop.eup %1329 }
 0x767   :  { %431 = vrot.lane.b32.xlu0 %v1330_v12, %s1374_s16 }
 0x7d9   :  { %v432_v13 = vpop.permute.xlu0 %431 }
 0x7da   :  { %v434_v15 = vmul.f32 %v1328_v3, %v432_v13 }
 0x7dc   :  { %v436_v16 = vrot.slane %v434_v15, 4 }
 0x7de   :  { %437 = vrot.lane.b32.xlu1 %v436_v16, %s1375_s3 }
 0x850   :  { %v438_v17 = vpop.permute.xlu1 %437 }
 0x851   :  { %1183 = vmatmul.mubr.msk.f32.vlgmr.msra.gmra.mrb[4].mxu0 %vm38_vm0, %v438_v17 }
 0x852   :  { %1280 = vmatpush3.bf16.msra.mxu0 %v1432_v9  ;;  %1204 = vmatprep.mubr.msk.f32.mxu0 %vm1372_vm1, %v1373_v4 }
 0x853   :  { %1281 = vmatprep.subr.bf16.mxu0 %v1371_v2 }
 0x856   :  { %1283 = vmatpush3.bf16.msra.mxu0 %v1445_v14 }
 0x857   :  { %1290 = vmatprep.subr.bf16.mxu0 %v1371_v2 }
 0x924   :  { %v507_v18 = vpop.f32.mrb[4].mxu0 }
 0x925   :  { %v512_v20 = vrot.slane %v507_v18, 2  ;;  %v1184_v21 = vpop.f32.mrb[5].mxu0 }
 0x927   :  { %v514_v23 = vadd.f32 %v512_v20, %v1473_v22 }
 0x929   :  { %1331 = vtanh.f32 %v514_v23  ;;  %v1068_v25 = vmul.f32 -1.442695, %v514_v23 }
 0x92b   :  { %1333 = vpow2.f32 %v1068_v25 }
 0x933   :  { %v1332_v24 = vpop.eup %1331 }
 0x934   :  { %527 = vrot.lane.b32.xlu0 %v1332_v24, %s1374_s16 }
 0x935   :  { %v1334_v26 = vpop.eup %1333 }
 0x936   :  { %v518_v27 = vadd.f32 1.0, %v1334_v26 }
 0x938   :  { %1335 = vrcp.f32 %v518_v27 }
 0x942   :  { %v1336_v28 = vpop.eup %1335 }
 0x943   :  { %v525_v32 = vmul.f32 %v1336_v28, %v523_v31 }
 0x9a6   :  { %v528_v29 = vpop.permute.xlu0 %527 }
 0x9a7   :  { %v530_v30 = vmul.f32 %v1336_v28, %v528_v29 }
 0x9a9   :  { %532 = vrot.lane.b32.xlu1 %v530_v30, %s1375_s3 }
 0xa1b   :  { %v533_v33 = vpop.permute.xlu1 %532 }
 0xa1c   :  { %v535_v34 = vadd.f32 %v533_v33, %v525_v32 }
 0xa1e   :  { %1337 = vtanh.f32 %v535_v34  ;;  %v627_v49 = vrot.slane %v535_v34, 6 }
 0xa28   :  { %v1338_v22 = vpop.eup %1337 }
 0xa29   :  { %538 = vrot.lane.b32.xlu0 %v1338_v22, %s1374_s16 }
 0xa9b   :  { %v539_v35 = vpop.permute.xlu0 %538 }
 0xa9c   :  { %v541_v36 = vmul.f32 %v1336_v28, %v539_v35 }
 0xa9e   :  { %v543_v37 = vrot.slane %v541_v36, 6 }
 0xaa0   :  { %544 = vrot.lane.b32.xlu1 %v543_v37, %s1375_s3 }
 0xb12   :  { %v545_v38 = vpop.permute.xlu1 %544 }
 0xb13   :  { %1194 = vmatmul.mubr.msk.f32.vlgmr.msra.gmra.mrb[4].mxu1 %vm38_vm0, %v545_v38 }
 0xb14   :  { %1286 = vmatpush3.bf16.msra.mxu1 %v1432_v9  ;;  %1215 = vmatprep.mubr.msk.f32.mxu1 %vm1372_vm1, %v1373_v4 }
 0xb15   :  { %1287 = vmatprep.subr.bf16.mxu1 %v1371_v2 }
 0xb18   :  { %1289 = vmatpush3.bf16.msra.mxu1 %v1445_v14 }
 0xb19   :  { %1296 = vmatprep.subr.bf16.mxu1 %v1371_v2 }
 0xbe6   :  { %v614_v39 = vpop.f32.mrb[4].mxu1 }
 0xbe7   :  { %v618_v40 = vadd.f32 %v614_v39, %v1471_v19  ;;  %v1195_v41 = vpop.f32.mrb[5].mxu1 }
 0xbe9   :  { %1339 = vtanh.f32 %v618_v40  ;;  %v1070_v43 = vmul.f32 -1.442695, %v618_v40 }
 0xbeb   :  { %1341 = vpow2.f32 %v1070_v43 }
 0xbf3   :  { %v1340_v42 = vpop.eup %1339 }
 0xbf4   :  { %631 = vrot.lane.b32.xlu0 %v1340_v42, %s1374_s16 }
 0xbf5   :  { %v1342_v44 = vpop.eup %1341 }
 0xbf6   :  { %v622_v45 = vadd.f32 1.0, %v1342_v44 }
 0xbf8   :  { %1343 = vrcp.f32 %v622_v45 }
 0xc02   :  { %v1344_v46 = vpop.eup %1343 }
 0xc03   :  { %v629_v50 = vmul.f32 %v1344_v46, %v627_v49 }
 0xc66   :  { %v632_v47 = vpop.permute.xlu0 %631 }
 0xc67   :  { %v634_v48 = vmul.f32 %v1344_v46, %v632_v47 }
 0xc69   :  { %636 = vrot.lane.b32.xlu1 %v634_v48, %s1375_s3 }
 0xcdb   :  { %v637_v51 = vpop.permute.xlu1 %636 }
 0xcdc   :  { %v639_v52 = vadd.f32 %v637_v51, %v629_v50  ;;  %v967_v50 = vld [vmem:[%s1577_s4 + $0x8] sm:$0xff]  ;;  %v968_v51 = vld [vmem:[%s1577_s4 + $0x10] sm:$0xff] }
 0xcde   :  { %1345 = vtanh.f32 %v639_v52 }
 0xce8   :  { %v1346_v53 = vpop.eup %1345 }
 0xce9   :  { %642 = vrot.lane.b32.xlu0 %v1346_v53, %s1374_s16  ;;  %v969_v53 = vld [vmem:[%s1577_s4 + $0x18] sm:$0xff] }
 0xd5b   :  { %v643_v54 = vpop.permute.xlu0 %642 }
 0xd5c   :  { %v645_v55 = vmul.f32 %v1344_v46, %v643_v54  ;;  %v1300_v54 = vpack.c.bf16 %v969_v53, %v968_v51 }
 0xd5e   :  { %647 = vrot.lane.b32.xlu1 %v645_v55, %s1375_s3 }
 0xdd0   :  { %v648_v56 = vpop.permute.xlu1 %647 }
 0xdd1   :  { %1205 = vmatmul.mubr.msk.f32.vlgmr.msra.gmra.mrb[6].mxu0 %vm38_vm0, %v648_v56  ;;  %v11_v56 = vstv %s1578_s5 }
 0xdd2   :  { %1292 = vmatpush3.bf16.msra.mxu0 %v1432_v9  ;;  %1226 = vmatprep.mubr.msk.f32.mxu0 %vm1372_vm1, %v1373_v4  ;;  %12 = vst [vmem:[#allocation2] sm:$0x1] %v11_v56 }
 0xdd3   :  { %1293 = vmatprep.subr.bf16.mxu0 %v1371_v2 }
 0xdd6   :  { %1295 = vmatpush3.bf16.msra.mxu0 %v1445_v14  ;;  %v733_v14 = vrot.slane %v639_v52, 6 }
 0xea4   :  { %v717_v57 = vpop.f32.mrb[6].mxu0 }
 0xea5   :  { %v722_v58 = vrot.slane %v717_v57, 6  ;;  %v1206_v59 = vpop.f32.mrb[7].mxu0 }
 0xea7   :  { %v724_v60 = vadd.f32 %v722_v58, %v1471_v19 }
 0xea9   :  { %1347 = vtanh.f32 %v724_v60  ;;  %v1072_v62 = vmul.f32 -1.442695, %v724_v60 }
 0xeab   :  { %1349 = vpow2.f32 %v1072_v62 }
 0xeb3   :  { %v1348_v61 = vpop.eup %1347 }
 0xeb4   :  { %737 = vrot.lane.b32.xlu0 %v1348_v61, %s1374_s16  ;;  %v1077_v61 = vld [vmem:[#allocation2] ss:$0 sm:$0xff] }
 0xeb5   :  { %v1350_v63 = vpop.eup %1349 }
 0xeb6   :  { %v728_v9 = vadd.f32 1.0, %v1350_v63 }
 0xeb8   :  { %1351 = vrcp.f32 %v728_v9 }
 0xec2   :  { %v1352_v0 = vpop.eup %1351 }
 0xec3   :  { %v735_v5 = vmul.f32 %v1352_v0, %v733_v14 }
 0xf26   :  { %v738_v1 = vpop.permute.xlu0 %737 }
 0xf27   :  { %v740_v3 = vmul.f32 %v1352_v0, %v738_v1 }
 0xf29   :  { %742 = vrot.lane.b32.xlu1 %v740_v3, %s1375_s3 }
 0xf9b   :  { %v743_v6 = vpop.permute.xlu1 %742 }
 0xf9c   :  { %v745_v7 = vadd.f32 %v743_v6, %v735_v5 }
 0xf9e   :  { %1353 = vtanh.f32 %v745_v7 }
 0xfa8   :  { %v1354_v8 = vpop.eup %1353 }
 0xfa9   :  { %748 = vrot.lane.b32.xlu0 %v1354_v8, %s1374_s16 }
0x101b   :  { %v749_v10 = vpop.permute.xlu0 %748 }
0x101c   :  { %v751_v11 = vmul.f32 %v1352_v0, %v749_v10 }
0x101e   :  { %v753_v12 = vrot.slane %v751_v11, 2 }
0x1020   :  { %754 = vrot.lane.b32.xlu1 %v753_v12, %s1375_s3 }
0x1092   :  { %v755_v13 = vpop.permute.xlu1 %754 }
0x1093   :  { %1216 = vmatmul.mubr.msk.f32.vlgmr.msra.gmra.mrb[6].mxu1 %vm38_vm0, %v755_v13 }
0x1094   :  { %1237 = vmatprep.mubr.msk.f32.mxu1 %vm1372_vm1, %v1373_v4  ;;  %v840_v4 = vrot.slane %v745_v7, 6 }
0x1166   :  { %v824_v15 = vpop.f32.mrb[6].mxu1 }
0x1167   :  { %v829_v16 = vrot.slane %v824_v15, 4  ;;  %v1217_v17 = vpop.f32.mrb[7].mxu1 }
0x1169   :  { %v831_v18 = vadd.f32 %v829_v16, %v1471_v19 }
0x116b   :  { %1355 = vtanh.f32 %v831_v18  ;;  %v1074_v21 = vmul.f32 -1.442695, %v831_v18 }
0x116d   :  { %1357 = vpow2.f32 %v1074_v21 }
0x1175   :  { %v1356_v20 = vpop.eup %1355 }
0x1176   :  { %844 = vrot.lane.b32.xlu0 %v1356_v20, %s1374_s16 }
0x1177   :  { %v1358_v23 = vpop.eup %1357 }
0x1178   :  { %v835_v24 = vadd.f32 1.0, %v1358_v23 }
0x117a   :  { %1359 = vrcp.f32 %v835_v24 }
0x1184   :  { %v1360_v25 = vpop.eup %1359 }
0x1185   :  { %v842_v28 = vmul.f32 %v1360_v25, %v840_v4 }
0x11e8   :  { %v845_v26 = vpop.permute.xlu0 %844 }
0x11e9   :  { %v847_v27 = vmul.f32 %v1360_v25, %v845_v26 }
0x11eb   :  { %849 = vrot.lane.b32.xlu1 %v847_v27, %s1375_s3 }
0x125d   :  { %v850_v29 = vpop.permute.xlu1 %849 }
0x125e   :  { %v852_v30 = vadd.f32 %v850_v29, %v842_v28 }
0x1260   :  { %1361 = vtanh.f32 %v852_v30  ;;  %v947_v46 = vrot.slane %v852_v30, 6 }
0x126a   :  { %v1362_v31 = vpop.eup %1361 }
0x126b   :  { %855 = vrot.lane.b32.xlu0 %v1362_v31, %s1374_s16 }
0x12dd   :  { %v856_v32 = vpop.permute.xlu0 %855 }
0x12de   :  { %v858_v33 = vmul.f32 %v1360_v25, %v856_v32 }
0x12e0   :  { %v860_v34 = vrot.slane %v858_v33, 4 }
0x12e2   :  { %861 = vrot.lane.b32.xlu1 %v860_v34, %s1375_s3 }
0x1354   :  { %v862_v22 = vpop.permute.xlu1 %861 }
0x1355   :  { %1227 = vmatmul.mubr.msk.f32.vlgmr.msra.gmra.mrb[8].mxu0 %vm38_vm0, %v862_v22 }
0x1428   :  { %v931_v35 = vpop.f32.mrb[8].mxu0 }
0x1429   :  { %v936_v36 = vrot.slane %v931_v35, 2  ;;  %v1228_v37 = vpop.f32.mrb[9].mxu0 }
0x142b   :  { %v938_v38 = vadd.f32 %v936_v36, %v1471_v19  ;;  %v966_v19 = vld [vmem:[%s1577_s4] sm:$0xff] }
0x142c   :  { %v1297_v52 = vpack.c.bf16 %v967_v50, %v966_v19 }
0x142d   :  { %1363 = vtanh.f32 %v938_v38  ;;  %v1076_v40 = vmul.f32 -1.442695, %v938_v38 }
0x142e   :  { %1298 = vmatpush3.bf16.msra.mxu1 %v1297_v52 }
0x142f   :  { %1365 = vpow2.f32 %v1076_v40  ;;  %1299 = vmatprep.subr.bf16.mxu1 %v1371_v2 }
0x1432   :  { %1301 = vmatpush3.bf16.msra.mxu1 %v1300_v54 }
0x1437   :  { %v1364_v39 = vpop.eup %1363 }
0x1438   :  { %951 = vrot.lane.b32.xlu0 %v1364_v39, %s1374_s16 }
0x1439   :  { %v1366_v41 = vpop.eup %1365 }
0x143a   :  { %v942_v42 = vadd.f32 1.0, %v1366_v41 }
0x143c   :  { %1367 = vrcp.f32 %v942_v42 }
0x1446   :  { %v1368_v43 = vpop.eup %1367 }
0x1447   :  { %v949_v47 = vmul.f32 %v1368_v43, %v947_v46 }
0x14aa   :  { %v952_v44 = vpop.permute.xlu0 %951 }
0x14ab   :  { %v954_v45 = vmul.f32 %v1368_v43, %v952_v44 }
0x14ad   :  { %956 = vrot.lane.b32.xlu1 %v954_v45, %s1375_s3 }
0x151f   :  { %v957_v48 = vpop.permute.xlu1 %956 }
0x1520   :  { %v959_v49 = vadd.f32 %v957_v48, %v949_v47 }
0x1522   :  { %1369 = vtanh.f32 %v959_v49 }
0x152c   :  { %v1370_v55 = vpop.eup %1369 }
0x152d   :  { %962 = vrot.lane.b32.xlu0 %v1370_v55, %s1374_s16 }
0x159f   :  { %v963_v57 = vpop.permute.xlu0 %962 }
0x15a0   :  { %v965_v58 = vmul.f32 %v1368_v43, %v963_v57 }
0x15a2   :  { %v978_v59 = vrot.slane %v965_v58, 6 }
0x15a4   :  { %979 = vrot.lane.b32.xlu1 %v978_v59, %s1375_s3 }
0x1616   :  { %v980_v60 = vpop.permute.xlu1 %979 }
0x1617   :  { %1238 = vmatmul.mubr.msk.f32.vlgmr.msra.gmra.mrb[8].mxu1 %vm38_vm0, %v980_v60 }
0x16ea   :  { %v1049_v62 = vpop.f32.mrb[8].mxu1 }
0x16eb   :  { %v1050_v2 = vadd.f32 %v1077_v61, %v1049_v62  ;;  %v1239_v63 = vpop.f32.mrb[9].mxu1 }
0x16ed   :  { %1054 = vst.msk [vmem:[%s1579_s6] sm:$0x3] %vm1053_vm2, %v1050_v2 }

// kernel: classification_forward.5
= control target key start
LH: loop header
LB: loop body
LE: loop exit
PB: predicated region body
PF: predicated region fallthrough
CT: control target
= control target key end

     0   :  { %vm72_vm0 = vcmask 261120   ;;  %v2479_v14 = vmov 0.0   ;;  %vm2480_vm1 = vmmov 0   ;;  %vm327_vm2 = vcmask 64512   ;;  %s2482_s19 = smov 120   ;;  %s2485_s21 = smov 16   ;;  %s2879_s2 = inlined_call_operand.vmem [shape: f32[32,32], index: 2, kind: input, shape index: {}]   ;;  %s2880_s0 = inlined_call_operand.vmem [shape: f32[16,32], index: 0, kind: input, shape index: {}]   ;;  %s2881_s4 = inlined_call_operand.vmem [shape: f32[32,32], index: 4, kind: input, shape index: {}]   ;;  %s2882_s6 = inlined_call_operand.vmem [shape: f32[32,32], index: 6, kind: input, shape index: {}]   ;;  %s2883_s5 = inlined_call_operand.vmem [shape: f32[1,32], index: 5, kind: input, shape index: {}]   ;;  %s2884_s3 = inlined_call_operand.vmem [shape: f32[1,32], index: 3, kind: input, shape index: {}]   ;;  %s2885_s7 = inlined_call_operand.vmem [shape: f32[1,32], index: 7, kind: input, shape index: {}]   ;;  %s2886_s1 = inlined_call_operand.vmem [shape: f32[2,8], index: 1, kind: input, shape index: {}]   ;;  %s2887_s8 = inlined_call_operand.vmem [shape: f32[32,32], index: 8, kind: input, shape index: {}]   ;;  %s2888_s9 = inlined_call_operand.vmem [shape: f32[1,32], index: 9, kind: input, shape index: {}]   ;;  %s2889_s12 = inlined_call_operand.vmem [shape: f32[32,64], index: 12, kind: input, shape index: {}]   ;;  %s2890_s10 = inlined_call_operand.vmem [shape: f32[1,32], index: 10, kind: input, shape index: {}]   ;;  %s2891_s11 = inlined_call_operand.vmem [shape: f32[1,32], index: 11, kind: input, shape index: {}]   ;;  %s2892_s14 = inlined_call_operand.vmem [shape: f32[64,32], index: 14, kind: input, shape index: {}]   ;;  %s2893_s13 = inlined_call_operand.vmem [shape: f32[1,64], index: 13, kind: input, shape index: {}]   ;;  %s2894_s15 = inlined_call_operand.vmem [shape: f32[1,32], index: 15, kind: input, shape index: {}]   ;;  %s2895_s16 = inlined_call_operand.vmem [shape: f32[1,32], index: 16, kind: input, shape index: {}]   ;;  %s2896_s17 = inlined_call_operand.vmem [shape: f32[1,32], index: 17, kind: input, shape index: {}]   ;;  %s2897_s18 = inlined_call_operand.vmem [shape: f32[16,32], index: 18, kind: output, shape index: {}]  }
   0x1   :  { %2901 = sst [smem:[#allocation3_spill]] %s2879_s2  ;;  %v240_v15 = vld [vmem:[%s2882_s6] sm:$0xff]  ;;  %v241_v16 = vld [vmem:[%s2882_s6 + $0x8] sm:$0xff]  ;;  %v242_v17 = vld [vmem:[%s2882_s6 + $0x10] sm:$0xff]  ;;  %s2481_s2 = smov 112   ;;  %v405_v48 = vlaneseq  ;;  %vm667_vm3 = vcmask 130112  }
   0x2   :  { %2902 = sst [smem:[#allocation4_spill]] %s2880_s0  ;;  %s2904_s29 = sld [smem:[#allocation3_spill]]  ;;  %v2387_v18 = vpack.c.bf16 %v241_v16, %v240_v15  ;;  %v243_v19 = vld [vmem:[%s2882_s6 + $0x18] sm:$0xff]  ;;  %v2102_v23 = vld [vmem:[%s2883_s5] ss:$0 sm:$0xff]  ;;  %vm840_vm4 = vcmask 195712  }
   0x3   :  { %2903 = sst [smem:[#allocation5_spill]] %s2881_s4  ;;  %s2905_s23 = sld [smem:[#allocation4_spill]]  ;;  %v2391_v20 = vpack.c.bf16 %v243_v19, %v242_v17  ;;  %v2099_v27 = vld [vmem:[%s2884_s3] ss:$0 sm:$0xff]  ;;  %v406_v49 = vshrl.u32 %v405_v48, 7  ;;  %vm1013_vm5 = vcmask 261312  }
   0x4   :  { %s2906_s26 = sld [smem:[#allocation5_spill]]  ;;  %2388 = vmatprep.subr.bf16.mxu0 %v2387_v18  ;;  %s2483_s3 = smov 104   ;;  %v2105_v33 = vld [vmem:[%s2885_s7] ss:$0 sm:$0xff]  ;;  %vm1965_vm6 = vcmask 523264  }
   0x5   :  { %2390 = vmatpush3.bf16.msra.mxu0 %v2387_v18  ;;  %v407_v50 = vsub.s32 0, %v406_v49  ;;  %v326_v51 = vld [vmem:[%s2886_s1] sm:$0x3]  ;;  %s2484_s1 = smov 8   ;;  %s2486_s22 = smov 24  }
   0x6   :  { %2392 = vmatprep.subr.bf16.mxu0 %v2391_v20 }
   0x7   :  { %v408_v52 = vrot.slane %v326_v51, %v407_v50 }
   0x8   :  { %v61_v0 = vld [vmem:[%s2904_s29] sm:$0xff]  ;;  %v62_v1 = vld [vmem:[%s2904_s29 + $0x8] sm:$0xff]  ;;  %v63_v2 = vld [vmem:[%s2904_s29 + $0x10] sm:$0xff] }
   0x9   :  { %v2371_v3 = vpack.c.bf16 %v62_v1, %v61_v0  ;;  %v64_v4 = vld [vmem:[%s2904_s29 + $0x18] sm:$0xff]  ;;  %v2597_v5 = vld [vmem:[%s2905_s23] sm:$0xff]  ;;  %v2618_v12 = vld [vmem:[%s2905_s23 + $0x8] sm:$0xff]  ;;  %2394 = vmatpush3.bf16.msra.mxu0 %v2391_v20 }
   0xa   :  { %v2375_v6 = vpack.c.bf16 %v64_v4, %v63_v2  ;;  %2225 = vmatprep.mubr.msk.f32.mxu1 %vm72_vm0, %v2597_v5  ;;  %v154_v7 = vld [vmem:[%s2906_s26] sm:$0xff]  ;;  %v155_v8 = vld [vmem:[%s2906_s26 + $0x8] sm:$0xff]  ;;  %2247 = vmatprep.mubr.msk.f32.mxu0 %vm72_vm0, %v2597_v5  ;;  %v156_v10 = vld [vmem:[%s2906_s26 + $0x10] sm:$0xff] }
   0xb   :  { %2372 = vmatprep.subr.bf16.mxu1 %v2371_v3  ;;  %v2379_v9 = vpack.c.bf16 %v155_v8, %v154_v7  ;;  %v157_v11 = vld [vmem:[%s2906_s26 + $0x18] sm:$0xff]  ;;  %2260 = vmatprep.subr.mxu0 %v2479_v14 }
   0xc   :  { %2374 = vmatpush3.bf16.msra.mxu1 %v2371_v3  ;;  %v2383_v13 = vpack.c.bf16 %v157_v11, %v156_v10  ;;  %2248 = vmatmul.mubr.msk.f32.vlgmr.msra.gmra.mrb[0].mxu0 %vm72_vm0, %v2618_v12  ;;  %v1094_v3 = vsub.s32 1, %v406_v49 }
   0xd   :  { %2376 = vmatprep.subr.bf16.mxu1 %v2375_v6  ;;  %2262 = vmatprep.mubr.msk.f32.mxu0 %vm2480_vm1, %v2479_v14 }
   0xe   :  { %v1095_v10 = vrot.slane %v326_v51, %v1094_v3 }
  0x10   :  { %2378 = vmatpush3.bf16.msra.mxu1 %v2375_v6 }
  0x11   :  { %2380 = vmatprep.subr.bf16.mxu1 %v2379_v9 }
  0x13   :  { %2226 = vmatmul.mubr.msk.f32.vlgmr.msra.gmra.mrb[0].mxu1 %vm72_vm0, %v2618_v12 }
  0x14   :  { %2382 = vmatpush3.bf16.msra.mxu1 %v2379_v9  ;;  %2236 = vmatprep.mubr.msk.f32.mxu1 %vm72_vm0, %v2597_v5 }
  0x15   :  { %2384 = vmatprep.subr.bf16.mxu1 %v2383_v13 }
  0x18   :  { %2386 = vmatpush3.bf16.msra.mxu1 %v2383_v13 }
  0x19   :  { %2250 = vmatprep.subr.mxu1 %v2479_v14 }
  0x1b   :  { %2237 = vmatmul.mubr.msk.f32.vlgmr.msra.gmra.mrb[2].mxu1 %vm72_vm0, %v2618_v12 }
  0x1c   :  { %2252 = vmatprep.mubr.msk.f32.mxu1 %vm2480_vm1, %v2479_v14 }
  0xdf   :  { %v2249_v34 = vpop.f32.mrb[0].mxu0 }
  0xe0   :  { %v2674_v35 = vadd.f32 %v2249_v34, %v2105_v33  ;;  %v317_v36 = vpop.f32.mrb[1].mxu0 }
  0xe1   :  { %v2676_v37 = vadd.f32 %v2105_v33, %v317_v36 }
  0xe6   :  { %v2227_v21 = vpop.f32.mrb[0].mxu1 }
  0xe7   :  { %v145_v22 = vpop.f32.mrb[1].mxu1  ;;  %v151_v29 = vadd.f32 %v2227_v21, %v2099_v27 }
  0xe8   :  { %v146_v28 = vadd.f32 %v2099_v27, %v145_v22 }
  0xee   :  { %v2238_v24 = vpop.f32.mrb[2].mxu1 }
  0xef   :  { %v231_v25 = vpop.f32.mrb[3].mxu1  ;;  %v237_v30 = vadd.f32 %v2238_v24, %v2102_v23 }
  0xf0   :  { %v232_v26 = vadd.f32 %v2102_v23, %v231_v25 }
  0xf2   :  { %671 = vrot.lane.b32.xlu1 %v232_v26, %s2481_s2  ;;  %497 = vrot.lane.b32.xlu0 %v232_v26, %s2482_s19 }
  0xf3   :  { %2251 = vmatpush3.xpose.msk.msra.mxu1 %vm327_vm2, %v232_v26 }
  0xf4   :  { %2255 = vmatprep.subr.mxu1 %v2479_v14 }
  0xf6   :  { %2253 = vmatmul.mubr.msk.f32.vlgmr.msra.gmra.mrb[4].mxu1 %vm327_vm2, %v146_v28  ;;  %669 = vrot.lane.b32.xlu1 %v146_v28, %s2481_s2 }
  0xf7   :  { %495 = vrot.lane.b32.xlu0 %v146_v28, %s2482_s19  ;;  %2257 = vmatprep.mubr.msk.f32.mxu1 %vm2480_vm1, %v2479_v14 }
  0xf8   :  { %2256 = vmatpush3.msra.mxu1 %v2676_v37 }
  0xf9   :  { %2265 = vmatprep.subr.mxu1 %v2479_v14 }
  0xfa   :  { %842 = vrot.lane.b32.xlu1 %v146_v28, %s2483_s3 }
  0xfb   :  { %844 = vrot.lane.b32.xlu0 %v232_v26, %s2483_s3 }
  0xfe   :  { %1182 = vrot.lane.b32.xlu1 %v151_v29, %s2482_s19 }
  0xff   :  { %1184 = vrot.lane.b32.xlu0 %v237_v30, %s2482_s19 }
 0x102   :  { %1355 = vrot.lane.b32.xlu1 %v151_v29, %s2481_s2 }
 0x103   :  { %1357 = vrot.lane.b32.xlu0 %v237_v30, %s2481_s2 }
 0x106   :  { %1527 = vrot.lane.b32.xlu1 %v151_v29, %s2483_s3 }
 0x107   :  { %1529 = vrot.lane.b32.xlu0 %v237_v30, %s2483_s3 }
 0x164   :  { %v672_v31 = vpop.permute.xlu1 %671  ;;  %v498_v32 = vpop.permute.xlu0 %497 }
 0x165   :  { %2261 = vmatpush3.xpose.msk.msra.mxu0 %vm327_vm2, %v498_v32 }
 0x166   :  { %2270 = vmatprep.subr.mxu0 %v2479_v14 }
 0x168   :  { %v670_v38 = vpop.permute.xlu1 %669 }
 0x169   :  { %v496_v39 = vpop.permute.xlu0 %495 }
 0x16a   :  { %2263 = vmatmul.mubr.msk.f32.vlgmr.msra.gmra.mrb[2].mxu0 %vm327_vm2, %v496_v39 }
 0x16b   :  { %2271 = vmatpush3.xpose.msk.msra.mxu0 %vm327_vm2, %v672_v31  ;;  %2272 = vmatprep.mubr.msk.f32.mxu0 %vm2480_vm1, %v2479_v14 }
 0x16c   :  { %2280 = vmatprep.subr.mxu0 %v2479_v14  ;;  %v843_v41 = vpop.permute.xlu1 %842 }
 0x16d   :  { %v845_v40 = vpop.permute.xlu0 %844 }
 0x16e   :  { %2273 = vmatmul.mubr.msk.f32.vlgmr.msra.gmra.mrb[4].mxu0 %vm327_vm2, %v670_v38 }
 0x16f   :  { %2281 = vmatpush3.xpose.msk.msra.mxu0 %vm327_vm2, %v845_v40  ;;  %2282 = vmatprep.mubr.msk.f32.mxu0 %vm2480_vm1, %v2479_v14 }
 0x170   :  { %2290 = vmatprep.subr.mxu0 %v2479_v14  ;;  %v1183_v43 = vpop.permute.xlu1 %1182 }
 0x171   :  { %v1185_v42 = vpop.permute.xlu0 %1184 }
 0x172   :  { %2283 = vmatmul.mubr.msk.f32.vlgmr.msra.gmra.mrb[6].mxu0 %vm327_vm2, %v843_v41 }
 0x173   :  { %2291 = vmatpush3.xpose.msk.msra.mxu0 %vm327_vm2, %v237_v30  ;;  %2292 = vmatprep.mubr.msk.f32.mxu0 %vm2480_vm1, %v2479_v14 }
 0x174   :  { %2300 = vmatprep.subr.mxu0 %v2479_v14  ;;  %v1356_v45 = vpop.permute.xlu1 %1355 }
 0x175   :  { %v1358_v44 = vpop.permute.xlu0 %1357 }
 0x176   :  { %2293 = vmatmul.mubr.msk.f32.vlgmr.msra.gmra.mrb[8].mxu0 %vm327_vm2, %v151_v29 }
 0x177   :  { %2301 = vmatpush3.xpose.msk.msra.mxu0 %vm327_vm2, %v1185_v42  ;;  %2302 = vmatprep.mubr.msk.f32.mxu0 %vm2480_vm1, %v2479_v14 }
 0x178   :  { %2310 = vmatprep.subr.mxu0 %v2479_v14  ;;  %v1528_v47 = vpop.permute.xlu1 %1527 }
 0x179   :  { %v1530_v46 = vpop.permute.xlu0 %1529 }
 0x17a   :  { %2303 = vmatmul.mubr.msk.f32.vlgmr.msra.gmra.mrb[10].mxu0 %vm327_vm2, %v1183_v43 }
 0x17b   :  { %2311 = vmatpush3.xpose.msk.msra.mxu0 %vm327_vm2, %v1358_v44  ;;  %2312 = vmatprep.mubr.msk.f32.mxu0 %vm2480_vm1, %v2479_v14 }
 0x17c   :  { %2320 = vmatprep.subr.mxu0 %v2479_v14 }
 0x17e   :  { %2313 = vmatmul.mubr.msk.f32.vlgmr.msra.gmra.mrb[12].mxu0 %vm327_vm2, %v1356_v45 }
 0x17f   :  { %2321 = vmatpush3.xpose.msk.msra.mxu0 %vm327_vm2, %v1530_v46  ;;  %2322 = vmatprep.mubr.msk.f32.mxu0 %vm2480_vm1, %v2479_v14 }
 0x182   :  { %2323 = vmatmul.mubr.msk.f32.vlgmr.msra.gmra.mrb[14].mxu0 %vm327_vm2, %v1528_v47 }
 0x1c9   :  { %v400_v53 = vpop.f32.mrb[4].mxu1 }
 0x1ca   :  { %v404_v54 = vmul.f32 0.35355338, %v400_v53  ;;  %v2254_v55 = vpop.f32.mrb[5].mxu1 }
 0x1cc   :  { %v409_v56 = vadd.f32 %v408_v52, %v404_v54 }
 0x1ce   :  { %v410_v57 = vsel %vm327_vm2, %v409_v56, -inf }
 0x1cf   :  { %411 = vmax.xlane.f32.xlu0 %v410_v57 }
 0x23d   :  { %v569_v58 = vpop.f32.mrb[2].mxu0 }
 0x23e   :  { %v573_v59 = vmul.f32 0.35355338, %v569_v58  ;;  %v2264_v60 = vpop.f32.mrb[3].mxu0 }
 0x240   :  { %v574_v61 = vadd.f32 %v573_v59, %v408_v52 }
 0x241   :  { %v743_v62 = vpop.f32.mrb[4].mxu0 }
 0x242   :  { %v747_v63 = vmul.f32 0.35355338, %v743_v62  ;;  %v2274_v0 = vpop.f32.mrb[5].mxu0  ;;  %v575_v1 = vsel %vm327_vm2, %v574_v61, -inf }
 0x243   :  { %576 = vmax.xlane.f32.xlu1 %v575_v1 }
 0x244   :  { %v748_v2 = vadd.f32 %v747_v63, %v408_v52 }
 0x245   :  { %v916_v4 = vpop.f32.mrb[6].mxu0 }
 0x246   :  { %v920_v6 = vmul.f32 0.35355338, %v916_v4  ;;  %v2284_v7 = vpop.f32.mrb[7].mxu0  ;;  %v749_v8 = vsel %vm327_vm2, %v748_v2, -inf }
 0x247   :  { %750 = vmax.xlane.f32.xlu0 %v749_v8 }
 0x248   :  { %v921_v9 = vadd.f32 %v920_v6, %v408_v52 }
 0x249   :  { %v1087_v11 = vpop.f32.mrb[8].mxu0 }
 0x24a   :  { %v1091_v13 = vmul.f32 0.35355338, %v1087_v11  ;;  %v2294_v15 = vpop.f32.mrb[9].mxu0  ;;  %v922_v16 = vsel %vm327_vm2, %v921_v9, -inf }
 0x24b   :  { %923 = vmax.xlane.f32.xlu0 %v922_v16 }
 0x24c   :  { %v1096_v17 = vadd.f32 %v1095_v10, %v1091_v13 }
 0x24d   :  { %v1256_v18 = vpop.f32.mrb[10].mxu0 }
 0x24e   :  { %v1260_v19 = vmul.f32 0.35355338, %v1256_v18  ;;  %v2304_v20 = vpop.f32.mrb[11].mxu0  ;;  %v1097_v21 = vsel %vm327_vm2, %v1096_v17, -inf }
 0x24f   :  { %1098 = vmax.xlane.f32.xlu1 %v1097_v21 }
 0x250   :  { %v1261_v22 = vadd.f32 %v1260_v19, %v1095_v10 }
 0x251   :  { %v1429_v23 = vpop.f32.mrb[12].mxu0 }
 0x252   :  { %v1433_v24 = vmul.f32 0.35355338, %v1429_v23  ;;  %v2314_v25 = vpop.f32.mrb[13].mxu0  ;;  %v1262_v26 = vsel %vm327_vm2, %v1261_v22, -inf }
 0x253   :  { %1263 = vmax.xlane.f32.xlu0 %v1262_v26 }
 0x254   :  { %v1434_v27 = vadd.f32 %v1433_v24, %v1095_v10 }
 0x255   :  { %v1601_v28 = vpop.f32.mrb[14].mxu0 }
 0x256   :  { %v1605_v29 = vmul.f32 0.35355338, %v1601_v28  ;;  %v2324_v30 = vpop.f32.mrb[15].mxu0  ;;  %v1435_v31 = vsel %vm327_vm2, %v1434_v27, -inf }
 0x257   :  { %1436 = vmax.xlane.f32.xlu1 %v1435_v31 }
 0x258   :  { %v1606_v32 = vadd.f32 %v1605_v29, %v1095_v10 }
 0x25a   :  { %v1607_v33 = vsel %vm327_vm2, %v1606_v32, -inf }
 0x25b   :  { %1608 = vmax.xlane.f32.xlu0 %v1607_v33 }
 0x25c   :  { %v412_v34 = vpop.xlane.xlu0 %411 }
 0x25d   :  { %v413_v36 = vsub.f32 %v409_v56, %v412_v34 }
 0x25f   :  { %v414_v38 = vmul.f32 1.442695, %v413_v36 }
 0x261   :  { %2435 = vpow2.f32 %v414_v38 }
 0x268   :  { %587 = vrot.lane.b32.xlu1 %v2676_v37, %s2482_s19 }
 0x26b   :  { %v2436_v39 = vpop.eup %2435 }
 0x26c   :  { %v416_v40 = vsel %vm327_vm2, %v2436_v39, 0.0 }
 0x28c   :  { %417 = vadd.xlane.f32.xlu1 %v416_v40 }
 0x29d   :  { %933 = vrot.lane.b32.xlu1 %v2676_v37, %s2483_s3 }
 0x2d0   :  { %v577_v41 = vpop.xlane.xlu1 %576 }
 0x2d1   :  { %v578_v42 = vsub.f32 %v574_v61, %v577_v41 }
 0x2d3   :  { %v579_v43 = vmul.f32 1.442695, %v578_v42 }
 0x2d4   :  { %v751_v44 = vpop.xlane.xlu0 %750 }
 0x2d5   :  { %2437 = vpow2.f32 %v579_v43  ;;  %v752_v45 = vsub.f32 %v748_v2, %v751_v44 }
 0x2d7   :  { %v753_v46 = vmul.f32 1.442695, %v752_v45 }
 0x2d8   :  { %v924_v51 = vpop.xlane.xlu0 %923 }
 0x2d9   :  { %2439 = vpow2.f32 %v753_v46  ;;  %v925_v52 = vsub.f32 %v921_v9, %v924_v51 }
 0x2db   :  { %v926_v56 = vmul.f32 1.442695, %v925_v52  ;;  %v1701_v52 = vld [vmem:[%s2887_s8] sm:$0xff] }
 0x2dc   :  { %v1099_v53 = vpop.xlane.xlu1 %1098 }
 0x2dd   :  { %v1100_v55 = vsub.f32 %v1096_v17, %v1099_v53  ;;  %2441 = vpow2.f32 %v926_v56  ;;  %v1702_v53 = vld [vmem:[%s2887_s8 + $0x8] sm:$0xff]  ;;  %v1703_v56 = vld [vmem:[%s2887_s8 + $0x10] sm:$0xff] }
 0x2df   :  { %v2438_v47 = vpop.eup %2437  ;;  %v1101_v60 = vmul.f32 1.442695, %v1100_v55 }
 0x2e0   :  { %v581_v48 = vsel %vm327_vm2, %v2438_v47, 0.0  ;;  %v1264_v54 = vpop.xlane.xlu0 %1263 }
 0x2e1   :  { %582 = vadd.xlane.f32.xlu0 %v581_v48  ;;  %v1265_v57 = vsub.f32 %v1261_v22, %v1264_v54  ;;  %2443 = vpow2.f32 %v1101_v60  ;;  %v2395_v54 = vpack.c.bf16 %v1702_v53, %v1701_v52  ;;  %v1951_v52 = vld [vmem:[%s2892_s14 + $0x8] sm:$0xff] }
 0x2e3   :  { %v2727_v49 = vpop.eup %2439  ;;  %v1266_v62 = vmul.f32 1.442695, %v1265_v57  ;;  %v1704_v57 = vld [vmem:[%s2887_s8 + $0x18] sm:$0xff]  ;;  %2396 = vmatprep.subr.bf16.mxu0 %v2395_v54 }
 0x2e4   :  { %v755_v50 = vsel %vm327_vm2, %v2727_v49, 0.0  ;;  %v1437_v58 = vpop.xlane.xlu1 %1436  ;;  %2398 = vmatpush3.bf16.msra.mxu0 %v2395_v54  ;;  %v1952_v54 = vld [vmem:[%s2892_s14 + $0x10] sm:$0xff] }
 0x2e5   :  { %756 = vadd.xlane.f32.xlu1 %v755_v50  ;;  %v1438_v61 = vsub.f32 %v1434_v27, %v1437_v58  ;;  %2445 = vpow2.f32 %v1266_v62 }
 0x2e7   :  { %v1439_v0 = vmul.f32 1.442695, %v1438_v61 }
 0x2e8   :  { %v1609_v59 = vpop.xlane.xlu0 %1608  ;;  %v588_v3 = vpop.permute.xlu1 %587 }
 0x2e9   :  { %v1610_v63 = vsub.f32 %v1606_v32, %v1609_v59  ;;  %2447 = vpow2.f32 %v1439_v0  ;;  %v2399_v59 = vpack.c.bf16 %v1704_v57, %v1703_v56  ;;  %v1954_v57 = vld [vmem:[%s2892_s14 + $0x20] sm:$0xff] }
 0x2eb   :  { %v1611_v1 = vmul.f32 1.442695, %v1610_v63  ;;  %2400 = vmatprep.subr.bf16.mxu0 %v2399_v59 }
 0x2ec   :  { %2402 = vmatpush3.bf16.msra.mxu0 %v2399_v59 }
 0x2ed   :  { %2449 = vpow2.f32 %v1611_v1 }
 0x2f6   :  { %1274 = vrot.lane.b32.xlu1 %v2674_v35, %s2482_s19 }
 0x2f7   :  { %760 = vrot.lane.b32.xlu0 %v2676_v37, %s2481_s2  ;;  %v2442_v37 = vpop.eup %2441 }
 0x2f8   :  { %v2444_v2 = vpop.eup %2443  ;;  %v928_v4 = vsel %vm327_vm2, %v2442_v37, 0.0 }
 0x2f9   :  { %v2736_v6 = vpop.eup %2445  ;;  %v1103_v9 = vsel %vm327_vm2, %v2444_v2, 0.0 }
 0x2fa   :  { %v2738_v7 = vpop.eup %2447  ;;  %v1268_v10 = vsel %vm327_vm2, %v2736_v6, 0.0 }
 0x2fb   :  { %v2743_v11 = vpop.eup %2449  ;;  %v1441_v13 = vsel %vm327_vm2, %v2738_v7, 0.0 }
 0x2fc   :  { %v1613_v15 = vsel %vm327_vm2, %v2743_v11, 0.0 }
 0x316   :  { %929 = vadd.xlane.f32.xlu0 %v928_v4 }
 0x319   :  { %v418_v8 = vpop.xlane.xlu1 %417 }
 0x31a   :  { %2451 = vrcp.f32 %v418_v8  ;;  %1104 = vadd.xlane.f32.xlu1 %v1103_v9  ;;  %1269 = vadd.xlane.f32.xlu0 %v1268_v10  ;;  %v2132_v10 = vld [vmem:[%s2888_s9] ss:$0 sm:$0xff] }
 0x31d   :  { %v934_v18 = vpop.permute.xlu1 %933 }
 0x31e   :  { %1442 = vadd.xlane.f32.xlu1 %v1441_v13  ;;  %1614 = vadd.xlane.f32.xlu0 %v1613_v15 }
 0x324   :  { %v2452_v16 = vpop.eup %2451 }
 0x325   :  { %v420_v17 = vmul.f32 %v2452_v16, %v2436_v39 }
 0x327   :  { %2258 = vmatmul.mubr.msk.f32.vlgmr.msra.gmra.mrb[6].mxu1 %vm327_vm2, %v420_v17 }
 0x328   :  { %2266 = vmatpush3.msra.mxu1 %v588_v3  ;;  %2267 = vmatprep.mubr.msk.f32.mxu1 %vm2480_vm1, %v2479_v14 }
 0x329   :  { %2275 = vmatprep.subr.mxu1 %v2479_v14 }
 0x32f   :  { %1618 = vrot.lane.b32.xlu1 %v2674_v35, %s2483_s3 }
 0x334   :  { %1446 = vrot.lane.b32.xlu0 %v2674_v35, %s2481_s2 }
 0x36e   :  { %v583_v19 = vpop.xlane.xlu0 %582 }
 0x36f   :  { %2453 = vrcp.f32 %v583_v19 }
 0x372   :  { %v757_v20 = vpop.xlane.xlu1 %756  ;;  %v761_v23 = vpop.permute.xlu0 %760 }
 0x373   :  { %2455 = vrcp.f32 %v757_v20 }
 0x376   :  { %v1275_v26 = vpop.permute.xlu1 %1274 }
 0x379   :  { %v2454_v21 = vpop.eup %2453 }
 0x37a   :  { %v585_v22 = vmul.f32 %v2454_v21, %v2438_v47 }
 0x37c   :  { %2268 = vmatmul.mubr.msk.f32.vlgmr.msra.gmra.mrb[8].mxu1 %vm327_vm2, %v585_v22 }
 0x37d   :  { %v2456_v24 = vpop.eup %2455  ;;  %2276 = vmatpush3.msra.mxu1 %v761_v23  ;;  %2277 = vmatprep.mubr.msk.f32.mxu1 %vm2480_vm1, %v2479_v14 }
 0x37e   :  { %v759_v25 = vmul.f32 %v2456_v24, %v2727_v49  ;;  %2285 = vmatprep.subr.mxu1 %v2479_v14 }
 0x380   :  { %2278 = vmatmul.mubr.msk.f32.vlgmr.msra.gmra.mrb[10].mxu1 %vm327_vm2, %v759_v25 }
 0x381   :  { %2286 = vmatpush3.msra.mxu1 %v934_v18  ;;  %2287 = vmatprep.mubr.msk.f32.mxu1 %vm2480_vm1, %v2479_v14 }
 0x382   :  { %2295 = vmatprep.subr.mxu1 %v2479_v14 }
 0x3a3   :  { %v930_v27 = vpop.xlane.xlu0 %929 }
 0x3a4   :  { %2457 = vrcp.f32 %v930_v27 }
 0x3a7   :  { %v1105_v28 = vpop.xlane.xlu1 %1104  ;;  %v1270_v29 = vpop.xlane.xlu0 %1269 }
 0x3a8   :  { %2459 = vrcp.f32 %v1105_v28 }
 0x3a9   :  { %2461 = vrcp.f32 %v1270_v29 }
 0x3ab   :  { %v1443_v30 = vpop.xlane.xlu1 %1442  ;;  %v1615_v33 = vpop.xlane.xlu0 %1614 }
 0x3ac   :  { %2463 = vrcp.f32 %v1443_v30  ;;  %v1841_v30 = vld [vmem:[%s2889_s12 + $0x8] sm:$0xff] }
 0x3ad   :  { %2465 = vrcp.f32 %v1615_v33  ;;  %v1843_v33 = vld [vmem:[%s2889_s12 + $0x18] sm:$0xff] }
 0x3ae   :  { %v2458_v31 = vpop.eup %2457 }
 0x3af   :  { %v932_v32 = vmul.f32 %v2458_v31, %v2442_v37  ;;  %v1447_v41 = vpop.permute.xlu0 %1446  ;;  %v1619_v43 = vpop.permute.xlu1 %1618 }
 0x3b1   :  { %2288 = vmatmul.mubr.msk.f32.vlgmr.msra.gmra.mrb[12].mxu1 %vm327_vm2, %v932_v32  ;;  %v1842_v32 = vld [vmem:[%s2889_s12 + $0x10] sm:$0xff] }
 0x3b2   :  { %v2460_v34 = vpop.eup %2459  ;;  %2296 = vmatpush3.msra.mxu1 %v2674_v35  ;;  %2297 = vmatprep.mubr.msk.f32.mxu1 %vm2480_vm1, %v2479_v14 }
 0x3b3   :  { %v1107_v36 = vmul.f32 %v2460_v34, %v2444_v2  ;;  %2305 = vmatprep.subr.mxu1 %v2479_v14  ;;  %v2462_v38 = vpop.eup %2461  ;;  %v2407_v34 = vpack.c.bf16 %v1843_v33, %v1842_v32 }
 0x3b4   :  { %v1272_v39 = vmul.f32 %v2462_v38, %v2736_v6 }
 0x3b5   :  { %2298 = vmatmul.mubr.msk.f32.vlgmr.msra.gmra.mrb[14].mxu1 %vm327_vm2, %v1107_v36 }
 0x3b6   :  { %2306 = vmatpush3.msra.mxu1 %v1275_v26  ;;  %2307 = vmatprep.mubr.msk.f32.mxu1 %vm2480_vm1, %v2479_v14  ;;  %v2464_v40 = vpop.eup %2463 }
 0x3b7   :  { %2315 = vmatprep.subr.mxu1 %v2479_v14  ;;  %v1445_v35 = vmul.f32 %v2464_v40, %v2738_v7  ;;  %v2466_v42 = vpop.eup %2465 }
 0x3b8   :  { %v1617_v44 = vmul.f32 %v2466_v42, %v2743_v11 }
 0x3b9   :  { %2308 = vmatmul.mubr.msk.f32.vlgmr.msra.gmra.mrb[16].mxu1 %vm327_vm2, %v1272_v39 }
 0x3ba   :  { %2316 = vmatpush3.msra.mxu1 %v1447_v41  ;;  %2317 = vmatprep.mubr.msk.f32.mxu1 %vm2480_vm1, %v2479_v14 }
 0x3bb   :  { %2325 = vmatprep.subr.mxu1 %v2479_v14 }
 0x3bd   :  { %2318 = vmatmul.mubr.msk.f32.vlgmr.msra.gmra.mrb[18].mxu1 %vm327_vm2, %v1445_v35 }
 0x3be   :  { %2326 = vmatpush3.msra.mxu1 %v1619_v43  ;;  %2327 = vmatprep.mubr.msk.f32.mxu1 %vm2480_vm1, %v2479_v14  ;;  %v2135_v43 = vld [vmem:[%s2890_s10] ss:$0 sm:$0xff] }
 0x3c1   :  { %2328 = vmatmul.mubr.msk.f32.vlgmr.msra.gmra.mrb[20].mxu1 %vm327_vm2, %v1617_v44 }
 0x3fa   :  { %v490_v45 = vpop.f32.mrb[6].mxu1 }
 0x3fb   :  { %494 = vst.msk [vmem:[#allocation2] sm:$0xff] %vm327_vm2, %v490_v45  ;;  %v2259_v46 = vpop.f32.mrb[7].mxu1  ;;  %v2136_v45 = vld [vmem:[%s2891_s11] ss:$0 sm:$0xff] }
 0x44f   :  { %v659_v47 = vpop.f32.mrb[8].mxu1 }
 0x450   :  { %664 = vrot.lane.b32.xlu0 %v659_v47, %s2484_s1  ;;  %v2269_v48 = vpop.f32.mrb[9].mxu1 }
 0x453   :  { %v832_v49 = vpop.f32.mrb[10].mxu1 }
 0x454   :  { %837 = vrot.lane.b32.xlu1 %v832_v49, %s2485_s21  ;;  %v2279_v50 = vpop.f32.mrb[11].mxu1 }
 0x484   :  { %v1005_v51 = vpop.f32.mrb[12].mxu1 }
 0x485   :  { %1010 = vrot.lane.b32.xlu1 %v1005_v51, %s2486_s22  ;;  %v2289_v14 = vpop.f32.mrb[13].mxu1 }
 0x486   :  { %v1950_v14 = vld [vmem:[%s2892_s14] sm:$0xff] }
 0x487   :  { %v2411_v53 = vpack.c.bf16 %v1951_v52, %v1950_v14  ;;  %v2144_v14 = vld [vmem:[%s2896_s17] ss:$0 sm:$0xff] }
 0x488   :  { %v1177_v55 = vpop.f32.mrb[14].mxu1 }
 0x489   :  { %1181 = vst.msk [vmem:[#allocation2 + $0x8] sm:$0xff] %vm327_vm2, %v1177_v55  ;;  %v2299_v58 = vpop.f32.mrb[15].mxu1  ;;  %2412 = vmatprep.subr.bf16.mxu0 %v2411_v53  ;;  %v1953_v55 = vld [vmem:[%s2892_s14 + $0x18] sm:$0xff] }
 0x48a   :  { %v2415_v56 = vpack.c.bf16 %v1953_v55, %v1952_v54  ;;  %v1955_v58 = vld [vmem:[%s2892_s14 + $0x28] sm:$0xff] }
 0x48b   :  { %v2419_v59 = vpack.c.bf16 %v1955_v58, %v1954_v57 }
 0x48c   :  { %v1346_v60 = vpop.f32.mrb[16].mxu1 }
 0x48d   :  { %1351 = vrot.lane.b32.xlu0 %v1346_v60, %s2484_s1  ;;  %v2309_v61 = vpop.f32.mrb[17].mxu1  ;;  %v1956_v60 = vld [vmem:[%s2892_s14 + $0x30] sm:$0xff] }
 0x48e   :  { %v1957_v61 = vld [vmem:[%s2892_s14 + $0x38] sm:$0xff] }
 0x490   :  { %v1518_v62 = vpop.f32.mrb[18].mxu1 }
 0x491   :  { %1523 = vrot.lane.b32.xlu0 %v1518_v62, %s2485_s21  ;;  %v2319_v63 = vpop.f32.mrb[19].mxu1  ;;  %v2423_v62 = vpack.c.bf16 %v1957_v61, %v1956_v60 }
 0x492   :  { %v2137_v63 = vld [vmem:[%s2893_s13] ss:$0 sm:$0xff] }
 0x494   :  { %v1690_v0 = vpop.f32.mrb[20].mxu1 }
 0x495   :  { %1695 = vrot.lane.b32.xlu1 %v1690_v0, %s2486_s22  ;;  %v2329_v1 = vpop.f32.mrb[21].mxu1 }
 0x4c2   :  { %v665_v37 = vpop.permute.xlu0 %664 }
 0x4c3   :  { %668 = vst.msk [vmem:[#allocation2] sm:$0xff] %vm667_vm3, %v665_v37 }
 0x4c6   :  { %v838_v2 = vpop.permute.xlu1 %837 }
 0x4c7   :  { %841 = vst.msk [vmem:[#allocation2] sm:$0xff] %vm840_vm4, %v838_v2 }
 0x4f7   :  { %v1011_v3 = vpop.permute.xlu1 %1010 }
 0x4f8   :  { %1014 = vst.msk [vmem:[#allocation2] sm:$0xff] %vm1013_vm5, %v1011_v3 }
 0x4ff   :  { %v1352_v4 = vpop.permute.xlu0 %1351  ;;  %v1699_v6 = vld [vmem:[#allocation2] sm:$0xff] }
 0x500   :  { %1354 = vst.msk [vmem:[#allocation2 + $0x8] sm:$0xff] %vm667_vm3, %v1352_v4  ;;  %2338 = vmatprep.mubr.msk.f32.mxu0 %vm72_vm0, %v1699_v6 }
 0x503   :  { %v1524_v7 = vpop.permute.xlu0 %1523 }
 0x504   :  { %1526 = vst.msk [vmem:[#allocation2 + $0x8] sm:$0xff] %vm840_vm4, %v1524_v7 }
 0x507   :  { %v1696_v8 = vpop.permute.xlu1 %1695 }
 0x508   :  { %1698 = vst.msk [vmem:[#allocation2 + $0x8] sm:$0xff] %vm1013_vm5, %v1696_v8 }
 0x50f   :  { %v1700_v9 = vld [vmem:[#allocation2 + $0x8] sm:$0xff] }
 0x510   :  { %2339 = vmatmul.mubr.msk.f32.vlgmr.msra.gmra.mrb[16].mxu0 %vm72_vm0, %v1700_v9 }
 0x511   :  { %2414 = vmatpush3.bf16.msra.mxu0 %v2411_v53 }
 0x512   :  { %2416 = vmatprep.subr.bf16.mxu0 %v2415_v56 }
 0x515   :  { %2418 = vmatpush3.bf16.msra.mxu0 %v2415_v56 }
 0x516   :  { %2420 = vmatprep.subr.bf16.mxu0 %v2419_v59 }
 0x519   :  { %2422 = vmatpush3.bf16.msra.mxu0 %v2419_v59 }
 0x51a   :  { %2424 = vmatprep.subr.bf16.mxu0 %v2423_v62 }
 0x51d   :  { %2426 = vmatpush3.bf16.msra.mxu0 %v2423_v62 }
 0x5e3   :  { %v2340_v11 = vpop.f32.mrb[16].mxu0 }
 0x5e4   :  { %v1790_v13 = vadd.f32 %v2340_v11, %v2132_v10  ;;  %v1784_v15 = vpop.f32.mrb[17].mxu0 }
 0x5e5   :  { %v1785_v16 = vadd.f32 %v2132_v10, %v1784_v15 }
 0x5e6   :  { %v1794_v17 = vadd.f32 %v1790_v13, %v2618_v12 }
 0x5e7   :  { %v1793_v18 = vadd.f32 %v1785_v16, %v2597_v5  ;;  %v1840_v5 = vld [vmem:[%s2889_s12] sm:$0xff] }
 0x5e8   :  { %v1800_v19 = vsel %vm72_vm0, %v1794_v17, 0.0  ;;  %v2403_v31 = vpack.c.bf16 %v1841_v30, %v1840_v5 }
 0x5e9   :  { %1801 = vadd.xlane.f32.xlu1 %v1800_v19  ;;  %v1797_v20 = vsel %vm72_vm0, %v1793_v18, 0.0 }
 0x5ea   :  { %1798 = vadd.xlane.f32.xlu0 %v1797_v20  ;;  %2404 = vmatprep.subr.bf16.mxu1 %v2403_v31 }
 0x5eb   :  { %2406 = vmatpush3.bf16.msra.mxu1 %v2403_v31 }
 0x5ec   :  { %2408 = vmatprep.subr.bf16.mxu1 %v2407_v34 }
 0x5ef   :  { %2410 = vmatpush3.bf16.msra.mxu1 %v2407_v34 }
 0x676   :  { %v1802_v21 = vpop.xlane.xlu1 %1801 }
 0x677   :  { %v1805_v22 = vmul.f32 0.03125, %v1802_v21  ;;  %v1799_v23 = vpop.xlane.xlu0 %1798 }
 0x678   :  { %v1804_v24 = vmul.f32 0.03125, %v1799_v23 }
 0x679   :  { %v1807_v25 = vsub.f32 %v1794_v17, %v1805_v22 }
 0x67a   :  { %v1806_v26 = vsub.f32 %v1793_v18, %v1804_v24  ;;  %v2140_v24 = vld [vmem:[%s2894_s15] ss:$0 sm:$0xff] }
 0x67b   :  { %v1809_v29 = vmul.f32 %v1807_v25, %v1807_v25 }
 0x67c   :  { %v1808_v27 = vmul.f32 %v1806_v26, %v1806_v26 }
 0x67d   :  { %v1813_v12 = vsel %vm72_vm0, %v1809_v29, 0.0 }
 0x67e   :  { %v1810_v28 = vsel %vm72_vm0, %v1808_v27, 0.0 }
 0x67f   :  { %1811 = vadd.xlane.f32.xlu0 %v1810_v28 }
 0x683   :  { %1814 = vadd.xlane.f32.xlu0 %v1813_v12 }
 0x70c   :  { %v1812_v36 = vpop.xlane.xlu0 %1811 }
 0x70d   :  { %v1816_v38 = vmul.f32 0.03125, %v1812_v36 }
 0x70f   :  { %v1818_v39 = vadd.f32 1e-12, %v1816_v38 }
 0x710   :  { %v1815_v40 = vpop.xlane.xlu0 %1814 }
 0x711   :  { %2467 = vrsqrt.f32 %v1818_v39  ;;  %v1817_v41 = vmul.f32 0.03125, %v1815_v40 }
 0x713   :  { %v1819_v35 = vadd.f32 1e-12, %v1817_v41 }
 0x715   :  { %2469 = vrsqrt.f32 %v1819_v35 }
 0x71b   :  { %v2468_v42 = vpop.eup %2467 }
 0x71c   :  { %v1822_v44 = vmul.f32 %v2468_v42, %v1806_v26 }
 0x71e   :  { %v1830_v46 = vmul.f32 %v2135_v43, %v1822_v44 }
 0x71f   :  { %v2470_v47 = vpop.eup %2469 }
 0x720   :  { %v1823_v48 = vmul.f32 %v2470_v47, %v1807_v25  ;;  %v1838_v49 = vadd.f32 %v2136_v45, %v1830_v46 }
 0x722   :  { %v1831_v50 = vmul.f32 %v2135_v43, %v1823_v48  ;;  %2349 = vmatprep.mubr.msk.f32.mxu1 %vm72_vm0, %v1838_v49 }
 0x724   :  { %v1839_v51 = vadd.f32 %v2136_v45, %v1831_v50 }
 0x726   :  { %2350 = vmatmul.mubr.msk.f32.vlgmr.msra.gmra.mrb[22].mxu1 %vm72_vm0, %v1839_v51 }
 0x7f9   :  { %v2351_v0 = vpop.f32.mrb[22].mxu1 }
 0x7fa   :  { %v1929_v1 = vadd.f32 %v2351_v0, %v2137_v63  ;;  %v1923_v37 = vpop.f32.mrb[23].mxu1 }
 0x7fb   :  { %v1924_v2 = vadd.f32 %v2137_v63, %v1923_v37 }
 0x7fc   :  { %v1933_v3 = vmul.f32 %v1929_v1, %v1929_v1 }
 0x7fd   :  { %v1932_v4 = vmul.f32 %v1924_v2, %v1924_v2 }
 0x7fe   :  { %v1935_v6 = vmul.f32 %v1933_v3, %v1929_v1 }
 0x7ff   :  { %v1934_v7 = vmul.f32 %v1932_v4, %v1924_v2 }
 0x800   :  { %v1937_v8 = vmul.f32 0.044715, %v1935_v6 }
 0x801   :  { %v1936_v9 = vmul.f32 0.044715, %v1934_v7 }
 0x802   :  { %v1939_v10 = vadd.f32 %v1937_v8, %v1929_v1 }
 0x803   :  { %v1938_v11 = vadd.f32 %v1936_v9, %v1924_v2 }
 0x804   :  { %v1941_v13 = vmul.f32 0.7978846, %v1939_v10 }
 0x805   :  { %v1940_v15 = vmul.f32 0.7978846, %v1938_v11 }
 0x806   :  { %2471 = vtanh.f32 %v1941_v13 }
 0x807   :  { %2473 = vtanh.f32 %v1940_v15 }
 0x810   :  { %v2472_v16 = vpop.eup %2471 }
 0x811   :  { %v2474_v17 = vpop.eup %2473  ;;  %v1945_v18 = vadd.f32 1.0, %v2472_v16 }
 0x812   :  { %v1944_v19 = vadd.f32 1.0, %v2474_v17 }
 0x813   :  { %v1947_v20 = vmul.f32 0.5, %v1945_v18 }
 0x814   :  { %v1946_v21 = vmul.f32 0.5, %v1944_v19 }
 0x815   :  { %v1949_v23 = vmul.f32 %v1947_v20, %v1929_v1 }
 0x816   :  { %v1948_v22 = vmul.f32 %v1946_v21, %v1924_v2 }
 0x818   :  { %2368 = vmatprep.mubr.msk.f32.mxu0 %vm1965_vm6, %v1948_v22 }
 0x819   :  { %2369 = vmatmul.mubr.msk.f32.vlgmr.msra.gmra.mrb[18].mxu0 %vm1965_vm6, %v1949_v23 }
 0x8ec   :  { %v2370_v25 = vpop.f32.mrb[18].mxu0 }
 0x8ed   :  { %v2044_v26 = vadd.f32 %v2370_v25, %v2140_v24  ;;  %v2038_v27 = vpop.f32.mrb[19].mxu0 }
 0x8ee   :  { %v2039_v28 = vadd.f32 %v2140_v24, %v2038_v27 }
 0x8ef   :  { %v2048_v29 = vadd.f32 %v2044_v26, %v1839_v51 }
 0x8f0   :  { %v2047_v12 = vadd.f32 %v2039_v28, %v1838_v49  ;;  %v2143_v49 = vld [vmem:[%s2895_s16] ss:$0 sm:$0xff] }
 0x8f1   :  { %v2054_v5 = vsel %vm72_vm0, %v2048_v29, 0.0 }
 0x8f2   :  { %2055 = vadd.xlane.f32.xlu0 %v2054_v5  ;;  %v2051_v30 = vsel %vm72_vm0, %v2047_v12, 0.0 }
 0x8f3   :  { %2052 = vadd.xlane.f32.xlu1 %v2051_v30 }
 0x97f   :  { %v2056_v31 = vpop.xlane.xlu0 %2055 }
 0x980   :  { %v2058_v32 = vmul.f32 0.03125, %v2056_v31  ;;  %v2053_v33 = vpop.xlane.xlu1 %2052 }
 0x981   :  { %v2057_v34 = vmul.f32 0.03125, %v2053_v33 }
 0x982   :  { %v2060_v36 = vsub.f32 %v2048_v29, %v2058_v32 }
 0x983   :  { %v2059_v38 = vsub.f32 %v2047_v12, %v2057_v34 }
 0x984   :  { %v2062_v39 = vmul.f32 %v2060_v36, %v2060_v36 }
 0x985   :  { %v2061_v40 = vmul.f32 %v2059_v38, %v2059_v38 }
 0x986   :  { %v2066_v41 = vsel %vm72_vm0, %v2062_v39, 0.0 }
 0x987   :  { %2067 = vadd.xlane.f32.xlu0 %v2066_v41  ;;  %v2063_v35 = vsel %vm72_vm0, %v2061_v40, 0.0 }
 0x988   :  { %2064 = vadd.xlane.f32.xlu1 %v2063_v35 }
 0xa14   :  { %v2068_v42 = vpop.xlane.xlu0 %2067 }
 0xa15   :  { %v2070_v43 = vmul.f32 0.03125, %v2068_v42  ;;  %v2065_v44 = vpop.xlane.xlu1 %2064 }
 0xa16   :  { %v2069_v45 = vmul.f32 0.03125, %v2065_v44 }
 0xa17   :  { %v2072_v46 = vadd.f32 1e-12, %v2070_v43 }
 0xa18   :  { %v2071_v47 = vadd.f32 1e-12, %v2069_v45 }
 0xa19   :  { %2475 = vrsqrt.f32 %v2072_v46 }
 0xa1a   :  { %2477 = vrsqrt.f32 %v2071_v47 }
 0xa23   :  { %v2476_v48 = vpop.eup %2475 }
 0xa24   :  { %v2478_v50 = vpop.eup %2477  ;;  %v2076_v51 = vmul.f32 %v2476_v48, %v2060_v36 }
 0xa25   :  { %v2075_v52 = vmul.f32 %v2478_v50, %v2059_v38 }
 0xa26   :  { %v2084_v53 = vmul.f32 %v2143_v49, %v2076_v51 }
 0xa27   :  { %v2083_v54 = vmul.f32 %v2143_v49, %v2075_v52 }
 0xa28   :  { %v2092_v55 = vadd.f32 %v2144_v14, %v2084_v53 }
 0xa29   :  { %v2091_v56 = vadd.f32 %v2144_v14, %v2083_v54 }
 0xa2a   :  { %2094 = vst.msk [vmem:[%s2897_s18 + $0x8] sm:$0xff] %vm72_vm0, %v2092_v55 }
 0xa2b   :  { %2093 = vst.msk [vmem:[%s2897_s18] sm:$0xff] %vm72_vm0, %v2091_v56 }

</bundles_post_ra>
